<compile_context>
chip_gen: v7x
topology: tpu7x:2x2x1
jax: 0.10.0
libtpu: 0.0.40
codegen_flags: <defaults>
</compile_context>

<pallas_src>
import jax
import jax.numpy as jnp
from jax.experimental import pallas as pl
from jax.experimental.pallas import tpu as pltpu

C_OUT = 1024          # conv output channels (as in the module)
N_CLS = 2             # dense output (start / end)
MAXPAD = 2            # padding of the k=5 conv; the input is padded once by MAXPAD


def _conv_head_kernel(xpad_ref, w1_ref, b1_ref, w3_ref, b3_ref, w5_ref, b5_ref,
                      wd_ref, bd_ref, out_ref):
    L = out_ref.shape[1]

    # Load the padded activation once (bf16 in HBM/VMEM -> half the DMA).  Upcast to f32 so the
    # five sublane-shifted views below take the plain 32-bit slice path, then cast each shared
    # view to bf16 right before it feeds the MXU (trivial VPU work, hidden under the matmuls).
    xp = xpad_ref[0].astype(jnp.float32)                               # (Lp, H)
    taps = [xp[j:j + L].astype(jnp.bfloat16) for j in range(2 * MAXPAD + 1)]

    def dense_cols(c, wdk):
        # Final Linear has only N_CLS=2 useful columns: an MXU pass would burn a full K-sweep per
        # 2-wide output, so do it on the VPU/XLU: elementwise multiply + lane reduction.
        # c: (L, C_OUT) f32, wdk: (N_CLS, C_OUT) f32  ->  list of (L, 1) columns.
        return [jnp.sum(c * wdk[n:n + 1, :], axis=-1, keepdims=True) for n in range(N_CLS)]

    # Incremental logits accumulation: only one (L, C_OUT) conv intermediate is live at a time.
    cols = [jnp.zeros((L, 1), jnp.float32) for _ in range(N_CLS)]

    # ---- Conv1d kernel_size=1 (pad 0): single tap at padded offset MAXPAD ----
    c = jnp.dot(taps[MAXPAD], w1_ref[...], preferred_element_type=jnp.float32)
    c = jnp.maximum(c + b1_ref[...], 0.0)
    cols = [a + b for a, b in zip(cols, dense_cols(c, wd_ref[0]))]

    # ---- Conv1d kernel_size=3 (pad 1): taps at padded offsets 1..3 ----
    c = jnp.dot(taps[1], w3_ref[0], preferred_element_type=jnp.float32)
    for j in range(1, 3):
        c = c + jnp.dot(taps[1 + j], w3_ref[j], preferred_element_type=jnp.float32)
    c = jnp.maximum(c + b3_ref[...], 0.0)
    cols = [a + b for a, b in zip(cols, dense_cols(c, wd_ref[1]))]

    # ---- Conv1d kernel_size=5 (pad 2): taps at padded offsets 0..4 ----
    c = jnp.dot(taps[0], w5_ref[0], preferred_element_type=jnp.float32)
    for j in range(1, 5):
        c = c + jnp.dot(taps[j], w5_ref[j], preferred_element_type=jnp.float32)
    c = jnp.maximum(c + b5_ref[...], 0.0)
    cols = [a + b for a, b in zip(cols, dense_cols(c, wd_ref[2]))]

    # Scatter the per-class columns into the (L, N_CLS) output tile with a lane-index mask
    # (avoids a narrow lane-concatenate), add the dense bias, store.
    lane = jax.lax.broadcasted_iota(jnp.int32, (L, N_CLS), 1)
    logits = jnp.zeros((L, N_CLS), jnp.float32)
    for n in range(N_CLS):
        logits = logits + jnp.where(lane == n, cols[n], 0.0)
    out_ref[0] = logits + bd_ref[...]


def conv_model_head(seq_out, params):
    """seq_out: (B, L, H) float32 -> (start_logits, end_logits), each (B, L)."""
    B, L, H = seq_out.shape
    w1, b1, w3, b3, w5, b5, wd, bd = params

    # bf16 MXU operands -- cast once here (f32 accumulation stays inside the kernel).
    w1b, w3b, w5b = (w.astype(jnp.bfloat16) for w in (w1, w3, w5))
    xpad = jnp.pad(seq_out.astype(jnp.bfloat16), ((0, 0), (MAXPAD, MAXPAD), (0, 0)))
    Lp = L + 2 * MAXPAD

    # Weights/biases never change across the grid -> single-buffer them (half the weight VMEM).
    def resident(shp):
        return pl.BlockSpec(shp, lambda b: (0,) * len(shp), pipeline_mode=pl.Buffered(1))

    logits = pl.pallas_call(
        _conv_head_kernel,
        out_shape=jax.ShapeDtypeStruct((B, L, N_CLS), jnp.float32),
        grid_spec=pltpu.PrefetchScalarGridSpec(
            num_scalar_prefetch=0,
            grid=(B,),
            in_specs=[
                # per-batch padded activation block (default double-buffering -> next batch
                # prefetches while the current one computes)
                pl.BlockSpec((1, Lp, H), lambda b: (b, 0, 0)),
                resident(w1b.shape), resident(b1.shape),
                resident(w3b.shape), resident(b3.shape),
                resident(w5b.shape), resident(b5.shape),
                resident(wd.shape), resident(bd.shape),
            ],
            out_specs=pl.BlockSpec((1, L, N_CLS), lambda b: (b, 0, 0)),
        ),
        compiler_params=pltpu.CompilerParams(
            dimension_semantics=("parallel",),          # B>=2 keeps both v7x TensorCores busy
            vmem_limit_bytes=48 * 1024 * 1024,          # full bf16 weight residency on v5e/v6e/v7x
        ),
    )(xpad, w1b, b1, w3b, b3, w5b, b5, wd, bd)

    start_logits = logits[..., 0]
    end_logits = logits[..., 1]
    return start_logits, end_logits


def init_params(key, hidden):
    """Deterministic synthetic parameters matching the module's shapes (pre-permuted).

    PyTorch Conv1d weights are (C_out, C_in, k); here each conv weight is stored as
    (k, C_in, C_out) so every tap is a (H, C_OUT) matmul operand (real checkpoints must be
    permuted with weight.permute(2, 1, 0)).  The Linear(3*1024, 2) weight (2, 3072) is split
    per conv and kept as (3, N_CLS, C_OUT).
    """
    ks = jax.random.split(key, 8)
    scale = 0.05
    w1 = scale * jax.random.normal(ks[0], (hidden, C_OUT), jnp.float32)        # Conv1d k=1
    b1 = scale * jax.random.normal(ks[1], (1, C_OUT), jnp.float32)
    w3 = scale * jax.random.normal(ks[2], (3, hidden, C_OUT), jnp.float32)     # Conv1d k=3
    b3 = scale * jax.random.normal(ks[3], (1, C_OUT), jnp.float32)
    w5 = scale * jax.random.normal(ks[4], (5, hidden, C_OUT), jnp.float32)     # Conv1d k=5
    b5 = scale * jax.random.normal(ks[5], (1, C_OUT), jnp.float32)
    wd = scale * jax.random.normal(ks[6], (3, N_CLS, C_OUT), jnp.float32)      # Linear 3072 -> 2
    bd = scale * jax.random.normal(ks[7], (1, N_CLS), jnp.float32)
    return (w1, b1, w3, b3, w5, b5, wd, bd)


def reference(seq_out, params):
    """Plain-JAX reference of the same head, using the same bf16 matmul operands / f32 acc."""
    w1, b1, w3, b3, w5, b5, wd, bd = params
    B, L, H = seq_out.shape
    xpad = jnp.pad(seq_out.astype(jnp.bfloat16), ((0, 0), (MAXPAD, MAXPAD), (0, 0)))
    w1b, w3b, w5b = (w.astype(jnp.bfloat16) for w in (w1, w3, w5))

    def conv(weight, k, pad):
        acc = 0.0
        for j in range(k):
            off = MAXPAD - pad + j
            acc = acc + jnp.einsum('blh,hc->blc', xpad[:, off:off + L], weight[j],
                                   preferred_element_type=jnp.float32)
        return acc

    c1 = jax.nn.relu(conv(w1b[None], 1, 0) + b1)
    c3 = jax.nn.relu(conv(w3b, 3, 1) + b3)
    c5 = jax.nn.relu(conv(w5b, 5, 2) + b5)
    logits = (jnp.einsum('blc,nc->bln', c1, wd[0])
              + jnp.einsum('blc,nc->bln', c3, wd[1])
              + jnp.einsum('blc,nc->bln', c5, wd[2]) + bd)
    return logits[..., 0], logits[..., 1]


if __name__ == "__main__":
    # TODO(synk): backbone AutoModel is not implemented; sequence_output is a synthetic stand-in.
    B, L, H = 2, 8, 32
    key = jax.random.PRNGKey(0)
    k_x, k_p = jax.random.split(key)
    seq_out = jax.random.normal(k_x, (B, L, H), jnp.float32)   # stand-in for backbone output
    params = init_params(k_p, H)

    start_logits, end_logits = conv_model_head(seq_out, params)
    jax.block_until_ready((start_logits, end_logits))

    ref_start, ref_end = reference(seq_out, params)
    assert start_logits.shape == (B, L) and end_logits.shape == (B, L)
    assert jnp.allclose(start_logits, ref_start, atol=1e-2, rtol=1e-2)
    assert jnp.allclose(end_logits, ref_end, atol=1e-2, rtol=1e-2)
    print("KERNEL_OK")
</pallas_src>

<mosaic_0001>
module attributes {stable_mosaic.version = 11 : i64} {
  func.func @_conv_head_kernel(%arg0: i32, %arg1: memref<1x12x32xbf16, #tpu.memory_space<vmem>>, %arg2: memref<32x1024xbf16, #tpu.memory_space<vmem>>, %arg3: memref<1x1024xf32, #tpu.memory_space<vmem>>, %arg4: memref<3x32x1024xbf16, #tpu.memory_space<vmem>>, %arg5: memref<1x1024xf32, #tpu.memory_space<vmem>>, %arg6: memref<5x32x1024xbf16, #tpu.memory_space<vmem>>, %arg7: memref<1x1024xf32, #tpu.memory_space<vmem>>, %arg8: memref<3x2x1024xf32, #tpu.memory_space<vmem>>, %arg9: memref<1x2xf32, #tpu.memory_space<vmem>>, %arg10: memref<1x8x2xf32, #tpu.memory_space<vmem>>) attributes {dimension_semantics = [#tpu.dimension_semantics<parallel>], iteration_bounds = array<i64: 2>, scalar_prefetch = 0 : i64, scratch_operands = 0 : i64, tpu.core_type = #tpu.core_type<tc>, window_params = [{transform_indices = @transform_0, window_bounds = array<i64: 1, 12, 32>}, {pipeline_mode = #tpu.pipeline_mode<synchronous>, transform_indices = @transform_1, window_bounds = array<i64: 32, 1024>}, {pipeline_mode = #tpu.pipeline_mode<synchronous>, transform_indices = @transform_2, window_bounds = array<i64: 1, 1024>}, {pipeline_mode = #tpu.pipeline_mode<synchronous>, transform_indices = @transform_3, window_bounds = array<i64: 3, 32, 1024>}, {pipeline_mode = #tpu.pipeline_mode<synchronous>, transform_indices = @transform_4, window_bounds = array<i64: 1, 1024>}, {pipeline_mode = #tpu.pipeline_mode<synchronous>, transform_indices = @transform_5, window_bounds = array<i64: 5, 32, 1024>}, {pipeline_mode = #tpu.pipeline_mode<synchronous>, transform_indices = @transform_6, window_bounds = array<i64: 1, 1024>}, {pipeline_mode = #tpu.pipeline_mode<synchronous>, transform_indices = @transform_7, window_bounds = array<i64: 3, 2, 1024>}, {pipeline_mode = #tpu.pipeline_mode<synchronous>, transform_indices = @transform_8, window_bounds = array<i64: 1, 2>}, {transform_indices = @transform_9, window_bounds = array<i64: 1, 8, 2>}]} {
    %c0 = arith.constant 0 : index
    %c0_0 = arith.constant 0 : index
    %c0_1 = arith.constant 0 : index
    %0 = vector.load %arg1[%c0, %c0_0, %c0_1] : memref<1x12x32xbf16, #tpu.memory_space<vmem>>, vector<1x12x32xbf16>
    %1 = vector.shape_cast %0 : vector<1x12x32xbf16> to vector<12x32xbf16>
    %2 = arith.extf %1 : vector<12x32xbf16> to vector<12x32xf32>
    %3 = vector.extract_strided_slice %2 {offsets = [0, 0], sizes = [8, 32], strides = [1, 1]} : vector<12x32xf32> to vector<8x32xf32>
    %4 = arith.truncf %3 : vector<8x32xf32> to vector<8x32xbf16>
    %5 = vector.extract_strided_slice %2 {offsets = [1, 0], sizes = [8, 32], strides = [1, 1]} : vector<12x32xf32> to vector<8x32xf32>
    %6 = arith.truncf %5 : vector<8x32xf32> to vector<8x32xbf16>
    %7 = vector.extract_strided_slice %2 {offsets = [2, 0], sizes = [8, 32], strides = [1, 1]} : vector<12x32xf32> to vector<8x32xf32>
    %8 = arith.truncf %7 : vector<8x32xf32> to vector<8x32xbf16>
    %9 = vector.extract_strided_slice %2 {offsets = [3, 0], sizes = [8, 32], strides = [1, 1]} : vector<12x32xf32> to vector<8x32xf32>
    %10 = arith.truncf %9 : vector<8x32xf32> to vector<8x32xbf16>
    %11 = vector.extract_strided_slice %2 {offsets = [4, 0], sizes = [8, 32], strides = [1, 1]} : vector<12x32xf32> to vector<8x32xf32>
    %12 = arith.truncf %11 : vector<8x32xf32> to vector<8x32xbf16>
    %cst = arith.constant 0.000000e+00 : f32
    %13 = vector.broadcast %cst : f32 to vector<8x1xf32>
    %cst_2 = arith.constant 0.000000e+00 : f32
    %14 = vector.broadcast %cst_2 : f32 to vector<8x1xf32>
    %c0_3 = arith.constant 0 : index
    %c0_4 = arith.constant 0 : index
    %15 = vector.load %arg2[%c0_3, %c0_4] : memref<32x1024xbf16, #tpu.memory_space<vmem>>, vector<32x1024xbf16>
    %cst_5 = arith.constant dense<0.000000e+00> : vector<8x1024xf32>
    %16 = tpu.matmul %8, %15, %cst_5 {dimension_numbers = #tpu.dot_dimension_numbers<[1], [0], [0], [1], [0, 0, 1, 1], [], []>} : vector<8x32xbf16>, vector<32x1024xbf16>, vector<8x1024xf32> -> vector<8x1024xf32>
    %c0_6 = arith.constant 0 : index
    %c0_7 = arith.constant 0 : index
    %17 = vector.load %arg3[%c0_6, %c0_7] : memref<1x1024xf32, #tpu.memory_space<vmem>>, vector<1x1024xf32>
    %18 = vector.broadcast %17 : vector<1x1024xf32> to vector<8x1024xf32>
    %19 = arith.addf %16, %18 : vector<8x1024xf32>
    %cst_8 = arith.constant 0.000000e+00 : f32
    %20 = vector.broadcast %cst_8 : f32 to vector<8x1024xf32>
    %21 = arith.maximumf %19, %20 : vector<8x1024xf32>
    %c0_9 = arith.constant 0 : index
    %c0_10 = arith.constant 0 : index
    %c0_11 = arith.constant 0 : index
    %22 = vector.load %arg8[%c0_9, %c0_10, %c0_11] : memref<3x2x1024xf32, #tpu.memory_space<vmem>>, vector<1x2x1024xf32>
    %23 = vector.shape_cast %22 : vector<1x2x1024xf32> to vector<2x1024xf32>
    %24 = vector.extract_strided_slice %23 {offsets = [0, 0], sizes = [1, 1024], strides = [1, 1]} : vector<2x1024xf32> to vector<1x1024xf32>
    %25 = vector.broadcast %24 : vector<1x1024xf32> to vector<8x1024xf32>
    %26 = arith.mulf %21, %25 : vector<8x1024xf32>
    %cst_12 = arith.constant dense<0.000000e+00> : vector<8xf32>
    %27 = vector.multi_reduction <add>, %26, %cst_12 [1] : vector<8x1024xf32> to vector<8xf32>
    %28 = vector.shape_cast %27 : vector<8xf32> to vector<8x1xf32>
    %29 = vector.extract_strided_slice %23 {offsets = [1, 0], sizes = [1, 1024], strides = [1, 1]} : vector<2x1024xf32> to vector<1x1024xf32>
    %30 = vector.broadcast %29 : vector<1x1024xf32> to vector<8x1024xf32>
    %31 = arith.mulf %21, %30 : vector<8x1024xf32>
    %cst_13 = arith.constant dense<0.000000e+00> : vector<8xf32>
    %32 = vector.multi_reduction <add>, %31, %cst_13 [1] : vector<8x1024xf32> to vector<8xf32>
    %33 = vector.shape_cast %32 : vector<8xf32> to vector<8x1xf32>
    %34 = arith.addf %13, %28 : vector<8x1xf32>
    %35 = arith.addf %14, %33 : vector<8x1xf32>
    %c0_14 = arith.constant 0 : index
    %c0_15 = arith.constant 0 : index
    %c0_16 = arith.constant 0 : index
    %36 = vector.load %arg4[%c0_14, %c0_15, %c0_16] : memref<3x32x1024xbf16, #tpu.memory_space<vmem>>, vector<1x32x1024xbf16>
    %37 = vector.shape_cast %36 : vector<1x32x1024xbf16> to vector<32x1024xbf16>
    %cst_17 = arith.constant dense<0.000000e+00> : vector<8x1024xf32>
    %38 = tpu.matmul %6, %37, %cst_17 {dimension_numbers = #tpu.dot_dimension_numbers<[1], [0], [0], [1], [0, 0, 1, 1], [], []>} : vector<8x32xbf16>, vector<32x1024xbf16>, vector<8x1024xf32> -> vector<8x1024xf32>
    %c1 = arith.constant 1 : index
    %c0_18 = arith.constant 0 : index
    %c0_19 = arith.constant 0 : index
    %39 = vector.load %arg4[%c1, %c0_18, %c0_19] : memref<3x32x1024xbf16, #tpu.memory_space<vmem>>, vector<1x32x1024xbf16>
    %40 = vector.shape_cast %39 : vector<1x32x1024xbf16> to vector<32x1024xbf16>
    %cst_20 = arith.constant dense<0.000000e+00> : vector<8x1024xf32>
    %41 = tpu.matmul %8, %40, %cst_20 {dimension_numbers = #tpu.dot_dimension_numbers<[1], [0], [0], [1], [0, 0, 1, 1], [], []>} : vector<8x32xbf16>, vector<32x1024xbf16>, vector<8x1024xf32> -> vector<8x1024xf32>
    %42 = arith.addf %38, %41 : vector<8x1024xf32>
    %c2 = arith.constant 2 : index
    %c0_21 = arith.constant 0 : index
    %c0_22 = arith.constant 0 : index
    %43 = vector.load %arg4[%c2, %c0_21, %c0_22] : memref<3x32x1024xbf16, #tpu.memory_space<vmem>>, vector<1x32x1024xbf16>
    %44 = vector.shape_cast %43 : vector<1x32x1024xbf16> to vector<32x1024xbf16>
    %cst_23 = arith.constant dense<0.000000e+00> : vector<8x1024xf32>
    %45 = tpu.matmul %10, %44, %cst_23 {dimension_numbers = #tpu.dot_dimension_numbers<[1], [0], [0], [1], [0, 0, 1, 1], [], []>} : vector<8x32xbf16>, vector<32x1024xbf16>, vector<8x1024xf32> -> vector<8x1024xf32>
    %46 = arith.addf %42, %45 : vector<8x1024xf32>
    %c0_24 = arith.constant 0 : index
    %c0_25 = arith.constant 0 : index
    %47 = vector.load %arg5[%c0_24, %c0_25] : memref<1x1024xf32, #tpu.memory_space<vmem>>, vector<1x1024xf32>
    %48 = vector.broadcast %47 : vector<1x1024xf32> to vector<8x1024xf32>
    %49 = arith.addf %46, %48 : vector<8x1024xf32>
    %cst_26 = arith.constant 0.000000e+00 : f32
    %50 = vector.broadcast %cst_26 : f32 to vector<8x1024xf32>
    %51 = arith.maximumf %49, %50 : vector<8x1024xf32>
    %c1_27 = arith.constant 1 : index
    %c0_28 = arith.constant 0 : index
    %c0_29 = arith.constant 0 : index
    %52 = vector.load %arg8[%c1_27, %c0_28, %c0_29] : memref<3x2x1024xf32, #tpu.memory_space<vmem>>, vector<1x2x1024xf32>
    %53 = vector.shape_cast %52 : vector<1x2x1024xf32> to vector<2x1024xf32>
    %54 = vector.extract_strided_slice %53 {offsets = [0, 0], sizes = [1, 1024], strides = [1, 1]} : vector<2x1024xf32> to vector<1x1024xf32>
    %55 = vector.broadcast %54 : vector<1x1024xf32> to vector<8x1024xf32>
    %56 = arith.mulf %51, %55 : vector<8x1024xf32>
    %cst_30 = arith.constant dense<0.000000e+00> : vector<8xf32>
    %57 = vector.multi_reduction <add>, %56, %cst_30 [1] : vector<8x1024xf32> to vector<8xf32>
    %58 = vector.shape_cast %57 : vector<8xf32> to vector<8x1xf32>
    %59 = vector.extract_strided_slice %53 {offsets = [1, 0], sizes = [1, 1024], strides = [1, 1]} : vector<2x1024xf32> to vector<1x1024xf32>
    %60 = vector.broadcast %59 : vector<1x1024xf32> to vector<8x1024xf32>
    %61 = arith.mulf %51, %60 : vector<8x1024xf32>
    %cst_31 = arith.constant dense<0.000000e+00> : vector<8xf32>
    %62 = vector.multi_reduction <add>, %61, %cst_31 [1] : vector<8x1024xf32> to vector<8xf32>
    %63 = vector.shape_cast %62 : vector<8xf32> to vector<8x1xf32>
    %64 = arith.addf %34, %58 : vector<8x1xf32>
    %65 = arith.addf %35, %63 : vector<8x1xf32>
    %c0_32 = arith.constant 0 : index
    %c0_33 = arith.constant 0 : index
    %c0_34 = arith.constant 0 : index
    %66 = vector.load %arg6[%c0_32, %c0_33, %c0_34] : memref<5x32x1024xbf16, #tpu.memory_space<vmem>>, vector<1x32x1024xbf16>
    %67 = vector.shape_cast %66 : vector<1x32x1024xbf16> to vector<32x1024xbf16>
    %cst_35 = arith.constant dense<0.000000e+00> : vector<8x1024xf32>
    %68 = tpu.matmul %4, %67, %cst_35 {dimension_numbers = #tpu.dot_dimension_numbers<[1], [0], [0], [1], [0, 0, 1, 1], [], []>} : vector<8x32xbf16>, vector<32x1024xbf16>, vector<8x1024xf32> -> vector<8x1024xf32>
    %c1_36 = arith.constant 1 : index
    %c0_37 = arith.constant 0 : index
    %c0_38 = arith.constant 0 : index
    %69 = vector.load %arg6[%c1_36, %c0_37, %c0_38] : memref<5x32x1024xbf16, #tpu.memory_space<vmem>>, vector<1x32x1024xbf16>
    %70 = vector.shape_cast %69 : vector<1x32x1024xbf16> to vector<32x1024xbf16>
    %cst_39 = arith.constant dense<0.000000e+00> : vector<8x1024xf32>
    %71 = tpu.matmul %6, %70, %cst_39 {dimension_numbers = #tpu.dot_dimension_numbers<[1], [0], [0], [1], [0, 0, 1, 1], [], []>} : vector<8x32xbf16>, vector<32x1024xbf16>, vector<8x1024xf32> -> vector<8x1024xf32>
    %72 = arith.addf %68, %71 : vector<8x1024xf32>
    %c2_40 = arith.constant 2 : index
    %c0_41 = arith.constant 0 : index
    %c0_42 = arith.constant 0 : index
    %73 = vector.load %arg6[%c2_40, %c0_41, %c0_42] : memref<5x32x1024xbf16, #tpu.memory_space<vmem>>, vector<1x32x1024xbf16>
    %74 = vector.shape_cast %73 : vector<1x32x1024xbf16> to vector<32x1024xbf16>
    %cst_43 = arith.constant dense<0.000000e+00> : vector<8x1024xf32>
    %75 = tpu.matmul %8, %74, %cst_43 {dimension_numbers = #tpu.dot_dimension_numbers<[1], [0], [0], [1], [0, 0, 1, 1], [], []>} : vector<8x32xbf16>, vector<32x1024xbf16>, vector<8x1024xf32> -> vector<8x1024xf32>
    %76 = arith.addf %72, %75 : vector<8x1024xf32>
    %c3 = arith.constant 3 : index
    %c0_44 = arith.constant 0 : index
    %c0_45 = arith.constant 0 : index
    %77 = vector.load %arg6[%c3, %c0_44, %c0_45] : memref<5x32x1024xbf16, #tpu.memory_space<vmem>>, vector<1x32x1024xbf16>
    %78 = vector.shape_cast %77 : vector<1x32x1024xbf16> to vector<32x1024xbf16>
    %cst_46 = arith.constant dense<0.000000e+00> : vector<8x1024xf32>
    %79 = tpu.matmul %10, %78, %cst_46 {dimension_numbers = #tpu.dot_dimension_numbers<[1], [0], [0], [1], [0, 0, 1, 1], [], []>} : vector<8x32xbf16>, vector<32x1024xbf16>, vector<8x1024xf32> -> vector<8x1024xf32>
    %80 = arith.addf %76, %79 : vector<8x1024xf32>
    %c4 = arith.constant 4 : index
    %c0_47 = arith.constant 0 : index
    %c0_48 = arith.constant 0 : index
    %81 = vector.load %arg6[%c4, %c0_47, %c0_48] : memref<5x32x1024xbf16, #tpu.memory_space<vmem>>, vector<1x32x1024xbf16>
    %82 = vector.shape_cast %81 : vector<1x32x1024xbf16> to vector<32x1024xbf16>
    %cst_49 = arith.constant dense<0.000000e+00> : vector<8x1024xf32>
    %83 = tpu.matmul %12, %82, %cst_49 {dimension_numbers = #tpu.dot_dimension_numbers<[1], [0], [0], [1], [0, 0, 1, 1], [], []>} : vector<8x32xbf16>, vector<32x1024xbf16>, vector<8x1024xf32> -> vector<8x1024xf32>
    %84 = arith.addf %80, %83 : vector<8x1024xf32>
    %c0_50 = arith.constant 0 : index
    %c0_51 = arith.constant 0 : index
    %85 = vector.load %arg7[%c0_50, %c0_51] : memref<1x1024xf32, #tpu.memory_space<vmem>>, vector<1x1024xf32>
    %86 = vector.broadcast %85 : vector<1x1024xf32> to vector<8x1024xf32>
    %87 = arith.addf %84, %86 : vector<8x1024xf32>
    %cst_52 = arith.constant 0.000000e+00 : f32
    %88 = vector.broadcast %cst_52 : f32 to vector<8x1024xf32>
    %89 = arith.maximumf %87, %88 : vector<8x1024xf32>
    %c2_53 = arith.constant 2 : index
    %c0_54 = arith.constant 0 : index
    %c0_55 = arith.constant 0 : index
    %90 = vector.load %arg8[%c2_53, %c0_54, %c0_55] : memref<3x2x1024xf32, #tpu.memory_space<vmem>>, vector<1x2x1024xf32>
    %91 = vector.shape_cast %90 : vector<1x2x1024xf32> to vector<2x1024xf32>
    %92 = vector.extract_strided_slice %91 {offsets = [0, 0], sizes = [1, 1024], strides = [1, 1]} : vector<2x1024xf32> to vector<1x1024xf32>
    %93 = vector.broadcast %92 : vector<1x1024xf32> to vector<8x1024xf32>
    %94 = arith.mulf %89, %93 : vector<8x1024xf32>
    %cst_56 = arith.constant dense<0.000000e+00> : vector<8xf32>
    %95 = vector.multi_reduction <add>, %94, %cst_56 [1] : vector<8x1024xf32> to vector<8xf32>
    %96 = vector.shape_cast %95 : vector<8xf32> to vector<8x1xf32>
    %97 = vector.extract_strided_slice %91 {offsets = [1, 0], sizes = [1, 1024], strides = [1, 1]} : vector<2x1024xf32> to vector<1x1024xf32>
    %98 = vector.broadcast %97 : vector<1x1024xf32> to vector<8x1024xf32>
    %99 = arith.mulf %89, %98 : vector<8x1024xf32>
    %cst_57 = arith.constant dense<0.000000e+00> : vector<8xf32>
    %100 = vector.multi_reduction <add>, %99, %cst_57 [1] : vector<8x1024xf32> to vector<8xf32>
    %101 = vector.shape_cast %100 : vector<8xf32> to vector<8x1xf32>
    %102 = arith.addf %64, %96 : vector<8x1xf32>
    %103 = arith.addf %65, %101 : vector<8x1xf32>
    %104 = tpu.iota {dimensions = array<i32: 1>} : vector<8x2xi32>
    %cst_58 = arith.constant 0.000000e+00 : f32
    %105 = vector.broadcast %cst_58 : f32 to vector<8x2xf32>
    %c0_i32 = arith.constant 0 : i32
    %106 = vector.broadcast %c0_i32 : i32 to vector<8x2xi32>
    %107 = arith.cmpi eq, %104, %106 : vector<8x2xi32>
    %cst_59 = arith.constant 0.000000e+00 : f32
    %108 = vector.shape_cast %102 : vector<8x1xf32> to vector<8x1xf32>
    %109 = vector.broadcast %108 : vector<8x1xf32> to vector<8x2xf32>
    %110 = vector.broadcast %cst_59 : f32 to vector<8x2xf32>
    %111 = arith.select %107, %109, %110 : vector<8x2xi1>, vector<8x2xf32>
    %112 = arith.addf %105, %111 : vector<8x2xf32>
    %c1_i32 = arith.constant 1 : i32
    %113 = vector.broadcast %c1_i32 : i32 to vector<8x2xi32>
    %114 = arith.cmpi eq, %104, %113 : vector<8x2xi32>
    %cst_60 = arith.constant 0.000000e+00 : f32
    %115 = vector.shape_cast %103 : vector<8x1xf32> to vector<8x1xf32>
    %116 = vector.broadcast %115 : vector<8x1xf32> to vector<8x2xf32>
    %117 = vector.broadcast %cst_60 : f32 to vector<8x2xf32>
    %118 = arith.select %114, %116, %117 : vector<8x2xi1>, vector<8x2xf32>
    %119 = arith.addf %112, %118 : vector<8x2xf32>
    %c0_61 = arith.constant 0 : index
    %c0_62 = arith.constant 0 : index
    %120 = vector.load %arg9[%c0_61, %c0_62] : memref<1x2xf32, #tpu.memory_space<vmem>>, vector<1x2xf32>
    %121 = vector.broadcast %120 : vector<1x2xf32> to vector<8x2xf32>
    %122 = arith.addf %119, %121 : vector<8x2xf32>
    %c0_63 = arith.constant 0 : index
    %c0_64 = arith.constant 0 : index
    %c0_65 = arith.constant 0 : index
    %123 = vector.load %arg10[%c0_63, %c0_64, %c0_65] : memref<1x8x2xf32, #tpu.memory_space<vmem>>, vector<1x8x2xf32>
    %124 = vector.shape_cast %123 : vector<1x8x2xf32> to vector<8x2xf32>
    %125 = vector.shape_cast %122 : vector<8x2xf32> to vector<1x8x2xf32>
    tpu.vector_store %arg10[%c0_63, %c0_64, %c0_65], %125 {strides = array<i32>} : memref<1x8x2xf32, #tpu.memory_space<vmem>>, vector<1x8x2xf32>,
    return
  }
  func.func @transform_0(%arg0: i32) -> (i32, i32, i32) {
    %c0_i32 = arith.constant 0 : i32
    %c0_i32_0 = arith.constant 0 : i32
    %c0_i32_1 = arith.constant 0 : i32
    return %arg0, %c0_i32, %c0_i32_0 : i32, i32, i32
  }
  func.func @transform_1(%arg0: i32) -> (i32, i32) {
    %c0_i32 = arith.constant 0 : i32
    %c0_i32_0 = arith.constant 0 : i32
    %c0_i32_1 = arith.constant 0 : i32
    return %c0_i32, %c0_i32_0 : i32, i32
  }
  func.func @transform_2(%arg0: i32) -> (i32, i32) {
    %c0_i32 = arith.constant 0 : i32
    %c0_i32_0 = arith.constant 0 : i32
    %c0_i32_1 = arith.constant 0 : i32
    return %c0_i32, %c0_i32_0 : i32, i32
  }
  func.func @transform_3(%arg0: i32) -> (i32, i32, i32) {
    %c0_i32 = arith.constant 0 : i32
    %c0_i32_0 = arith.constant 0 : i32
    %c0_i32_1 = arith.constant 0 : i32
    %c0_i32_2 = arith.constant 0 : i32
    return %c0_i32, %c0_i32_0, %c0_i32_1 : i32, i32, i32
  }
  func.func @transform_4(%arg0: i32) -> (i32, i32) {
    %c0_i32 = arith.constant 0 : i32
    %c0_i32_0 = arith.constant 0 : i32
    %c0_i32_1 = arith.constant 0 : i32
    return %c0_i32, %c0_i32_0 : i32, i32
  }
  func.func @transform_5(%arg0: i32) -> (i32, i32, i32) {
    %c0_i32 = arith.constant 0 : i32
    %c0_i32_0 = arith.constant 0 : i32
    %c0_i32_1 = arith.constant 0 : i32
    %c0_i32_2 = arith.constant 0 : i32
    return %c0_i32, %c0_i32_0, %c0_i32_1 : i32, i32, i32
  }
  func.func @transform_6(%arg0: i32) -> (i32, i32) {
    %c0_i32 = arith.constant 0 : i32
    %c0_i32_0 = arith.constant 0 : i32
    %c0_i32_1 = arith.constant 0 : i32
    return %c0_i32, %c0_i32_0 : i32, i32
  }
  func.func @transform_7(%arg0: i32) -> (i32, i32, i32) {
    %c0_i32 = arith.constant 0 : i32
    %c0_i32_0 = arith.constant 0 : i32
    %c0_i32_1 = arith.constant 0 : i32
    %c0_i32_2 = arith.constant 0 : i32
    return %c0_i32, %c0_i32_0, %c0_i32_1 : i32, i32, i32
  }
  func.func @transform_8(%arg0: i32) -> (i32, i32) {
    %c0_i32 = arith.constant 0 : i32
    %c0_i32_0 = arith.constant 0 : i32
    %c0_i32_1 = arith.constant 0 : i32
    return %c0_i32, %c0_i32_0 : i32, i32
  }
  func.func @transform_9(%arg0: i32) -> (i32, i32, i32) {
    %c0_i32 = arith.constant 0 : i32
    %c0_i32_0 = arith.constant 0 : i32
    %c0_i32_1 = arith.constant 0 : i32
    return %arg0, %c0_i32, %c0_i32_0 : i32, i32, i32
  }
}

</mosaic_0001>

<bundles_post_ra>
// kernel: tpu_custom_call.1
= control target key start
LH: loop header
LB: loop body
LE: loop exit
PB: predicated region body
PF: predicated region fallthrough
CT: control target
= control target key end

     0   :  { %14 = vsyncpa [#allocation3], 0  ;;  %s4783_s0 = inlined_call_operand.vmem [shape: bf16[2,12,32], index: 0, kind: input, shape index: {}]   ;;  %s4784_s1 = inlined_call_operand.hbm [shape: bf16[32,1024], index: 1, kind: input, shape index: {}]   ;;  %s4785_s2 = inlined_call_operand.hbm [shape: f32[1,1024], index: 2, kind: input, shape index: {}]   ;;  %s4786_s3 = inlined_call_operand.hbm [shape: bf16[3,32,1024], index: 3, kind: input, shape index: {}]   ;;  %s4787_s4 = inlined_call_operand.hbm [shape: f32[1,1024], index: 4, kind: input, shape index: {}]   ;;  %s4788_s5 = inlined_call_operand.hbm [shape: bf16[5,32,1024], index: 5, kind: input, shape index: {}]   ;;  %s4789_s6 = inlined_call_operand.hbm [shape: f32[1,1024], index: 6, kind: input, shape index: {}]   ;;  %s4790_s7 = inlined_call_operand.vmem [shape: f32[3,2,1024], index: 7, kind: input, shape index: {}]   ;;  %s4791_s8 = inlined_call_operand.vmem [shape: f32[1,2], index: 8, kind: input, shape index: {}]   ;;  %s4792_s9 = inlined_call_operand.vmem [shape: f32[2,8,2], index: 9, kind: output, shape index: {}]  }
   0x1   :  { %15 = vsyncpa [#allocation5], 0 }
   0x2   :  { %16 = vsyncpa [#allocation8], 0 }
   0x3   :  { %17 = vsyncpa [#allocation11], 0  ;;  %s4213_s30 = smov 0  }
   0x4 LB: > { %s4154_s10 = smov [#allocation4]   ;;  %s4219_s12 = sadd.s32 4294967295, %s4152_s30   ;;  %s4152_s30 = sphi %s4213_s30, %s23_s30  }
   0x5   : > { %s274_s11 = sshll.u32 %s4154_s10, 4  ;;  %p3680_p0 = scmp.ge.s32.totalorder %s4152_s30, 1  ;;  %s4224_s11 = int_to_ptr.vmem [resolvable:$true] %s274_s11 }
   0x6   : > { %p248_p1 = scmp.lt.s32.totalorder %s4152_s30, 3  ;;  %p4793_p2 = scmp.eq.s32.totalorder %s4219_s12, 0 }
   0x7   : > { %s4155_s14 = smov [#allocation7]   ;;  %s4156_s16 = smov [#allocation2]  }
   0x8   : > { %p4226_p3 = pnand %p3680_p0, %p248_p1  ;;  %s298_s15 = sshll.u32 %s4155_s14, 4  ;;  %s4232_s15 = int_to_ptr.vmem [resolvable:$true] %s298_s15 }
   0x9   : > { %s260_s17 = sshll.u32 %s4156_s16, 4  ;;  %s4157_s19 = smov [#allocation6]   ;;  %s4240_s17 = int_to_ptr.vmem [resolvable:$true] %s260_s17 }
   0xa   : > { %s4795_s13 = scalar_select %p4226_p3, 1, 0 }
   0xb   : > { %p3912_p4 = pneg %p4226_p3  ;;  %s4242_s20 = sshll.u32 %s4157_s19, 4  ;;  %s285_s20 = int_to_ptr.vmem [resolvable:$true] %s4242_s20 }
   0xc   : > { %s3962_s23 = scalar_lea.hbm %s4785_s2, 128 }
   0xd   : > { %p4236_p5 = pnand %p4793_p2, %p3912_p4  ;;  %p3963_p6 = scmp.ne.s32.totalorder %s4785_s2, %s3962_s23 }
   0xe   : > { %p3969_p10 = scmp.lt.u32.totalorder %s3962_s23, %s4785_s2 }
   0xf   : > { %p4252_p7 = pneg %p4236_p5 }
  0x11   : > { %p3965_p8 = pnand %p4252_p7, %p3963_p6 }
  0x13   : > { %p3966_p9 = pneg %p3965_p8 }
  0x15   : > { %p3971_p11 = pnand %p3969_p10, %p3966_p9 }
  0x17   : > { %3974 = shalt.err (!%p3971_p11)
}
  0x18   : > { %s3975_s29 = scalar_lea.vmem %s4224_s11, 128  ;;  %p3983_p1 = scmp.lt.s32.totalorder %s4224_s11, %s4224_s11 }
  0x19   : > { %p3976_p12 = scmp.ne.s32.totalorder %s4224_s11, %s3975_s29  ;;  %p3984_p4 = scmp.lt.s32.totalorder %s3975_s29, %s3975_s29 }
  0x1b   : > { %p3978_p13 = pnand %p3976_p12, %p4252_p7  ;;  %p3985_p6 = por %p3984_p4, %p3983_p1 }
  0x1d   : > { %p3979_p0 = pneg %p3978_p13 }
  0x1f   : > { %p3986_p8 = pnand %p3985_p6, %p3979_p0 }
  0x21   : > { %3989 = shalt.err (!%p3986_p8)
}
  0x22   : > { %3918 = dma.hbm_to_vmem [thread:$0]  (!%p4236_p5), %s4785_s2, 128, %s4224_s11, [#allocation5]  }
  0x23   : > { %s3990_s21 = scalar_lea.hbm %s4787_s4, 128 }
  0x24   : > { %p3991_p9 = scmp.ne.s32.totalorder %s4787_s4, %s3990_s21  ;;  %p3997_p12 = scmp.lt.u32.totalorder %s3990_s21, %s4787_s4 }
  0x26   : > { %p3993_p10 = pnand %p3991_p9, %p4252_p7 }
  0x28   : > { %p3994_p11 = pneg %p3993_p10 }
  0x2a   : > { %p3999_p13 = pnand %p3997_p12, %p3994_p11 }
  0x2c   : > { %4002 = shalt.err (!%p3999_p13)
}
  0x2d   : > { %s4003_s11 = scalar_lea.vmem %s4232_s15, 128  ;;  %p4011_p6 = scmp.lt.s32.totalorder %s4232_s15, %s4232_s15 }
  0x2e   : > { %p4004_p0 = scmp.ne.s32.totalorder %s4232_s15, %s4003_s11  ;;  %p4012_p8 = scmp.lt.s32.totalorder %s4003_s11, %s4003_s11 }
  0x30   : > { %p4006_p1 = pnand %p4004_p0, %p4252_p7  ;;  %p4013_p9 = por %p4012_p8, %p4011_p6 }
  0x32   : > { %p4007_p4 = pneg %p4006_p1 }
  0x34   : > { %p4014_p10 = pnand %p4013_p9, %p4007_p4 }
  0x36   : > { %4017 = shalt.err (!%p4014_p10)
}
  0x37   : > { %3924 = dma.hbm_to_vmem [thread:$0]  (!%p4236_p5), %s4787_s4, 128, %s4232_s15, [#allocation8]  }
  0x38   : > { %s4018_s14 = scalar_lea.hbm %s4784_s1, 2048 }
  0x39   : > { %p4019_p11 = scmp.ne.s32.totalorder %s4784_s1, %s4018_s14  ;;  %p4025_p0 = scmp.lt.u32.totalorder %s4018_s14, %s4784_s1 }
  0x3b   : > { %p4021_p12 = pnand %p4019_p11, %p4252_p7 }
  0x3d   : > { %p4022_p13 = pneg %p4021_p12 }
  0x3f   : > { %p4027_p1 = pnand %p4025_p0, %p4022_p13 }
  0x41   : > { %4030 = shalt.err (!%p4027_p1)
}
  0x42   : > { %s4031_s15 = scalar_lea.vmem %s4240_s17, 2048  ;;  %p4039_p9 = scmp.lt.s32.totalorder %s4240_s17, %s4240_s17 }
  0x43   : > { %p4032_p4 = scmp.ne.s32.totalorder %s4240_s17, %s4031_s15  ;;  %p4040_p10 = scmp.lt.s32.totalorder %s4031_s15, %s4031_s15 }
  0x45   : > { %p4034_p6 = pnand %p4032_p4, %p4252_p7  ;;  %p4041_p11 = por %p4040_p10, %p4039_p9 }
  0x47   : > { %p4035_p8 = pneg %p4034_p6 }
  0x49   : > { %p4042_p12 = pnand %p4041_p11, %p4035_p8 }
  0x4b   : > { %4045 = shalt.err (!%p4042_p12)
}
  0x4c   : > { %s4158_s23 = smov 512   ;;  %s4159_s24 = smov 32  }
  0x4d   : > { %3915 = dma.hbm_to_vmem [thread:$0]  (!%p4236_p5), %s4784_s1, 2048, %s4240_s17, [#allocation3], %s4158_s23, %s4158_s23, %s4159_s24  }
  0x4e   : > { %s4046_s29 = scalar_lea.hbm %s4786_s3, 6144 }
  0x4f   : > { %p4047_p13 = scmp.ne.s32.totalorder %s4786_s3, %s4046_s29  ;;  %p4053_p4 = scmp.lt.u32.totalorder %s4046_s29, %s4786_s3 }
  0x51   : > { %p4049_p0 = pnand %p4047_p13, %p4252_p7 }
  0x53   : > { %p4050_p1 = pneg %p4049_p0 }
  0x55   : > { %p4055_p6 = pnand %p4053_p4, %p4050_p1 }
  0x57   : > { %4058 = shalt.err (!%p4055_p6)
}
  0x58   : > { %s4059_s21 = scalar_lea.vmem %s285_s20, 6144  ;;  %p4067_p11 = scmp.lt.s32.totalorder %s285_s20, %s285_s20 }
  0x59   : > { %p4060_p8 = scmp.ne.s32.totalorder %s285_s20, %s4059_s21  ;;  %p4068_p12 = scmp.lt.s32.totalorder %s4059_s21, %s4059_s21 }
  0x5b   : > { %p4062_p9 = pnand %p4060_p8, %p4252_p7  ;;  %p4069_p2 = por %p4068_p12, %p4067_p11 }
  0x5d   : > { %p4063_p10 = pneg %p4062_p9 }
  0x5f   : > { %p4070_p3 = pnand %p4069_p2, %p4063_p10 }
  0x61   : > { %4073 = shalt.err (!%p4070_p3)
}
  0x62   : > { %3921 = dma.hbm_to_vmem [thread:$0]  (!%p4236_p5), %s4786_s3, 6144, %s285_s20, [#allocation5], %s4158_s23, %s4158_s23, %s4159_s24  }
  0x63   : > { %s4160_s15 = smov [#allocation9]   ;;  %s4161_s11 = smov [#allocation10]  }
  0x64   : > { %s308_s25 = sshll.u32 %s4160_s15, 4  ;;  %s322_s27 = sshll.u32 %s4161_s11, 4  ;;  %s309_s25 = int_to_ptr.vmem [resolvable:$true] %s308_s25  ;;  %s323_s27 = int_to_ptr.vmem [resolvable:$true] %s322_s27 }
  0x65   : > { %s4074_s10 = scalar_lea.hbm %s4788_s5, 10240 }
  0x66   : > { %p4075_p2 = scmp.ne.s32.totalorder %s4788_s5, %s4074_s10  ;;  %p4081_p0 = scmp.lt.u32.totalorder %s4074_s10, %s4788_s5 }
  0x68   : > { %p4077_p3 = pnand %p4075_p2, %p4252_p7 }
  0x6a   : > { %p4078_p13 = pneg %p4077_p3 }
  0x6c   : > { %p4083_p1 = pnand %p4081_p0, %p4078_p13 }
  0x6e   : > { %4086 = shalt.err (!%p4083_p1)
}
  0x6f   : > { %s4087_s20 = scalar_lea.vmem %s309_s25, 10240  ;;  %p4095_p9 = scmp.lt.s32.totalorder %s309_s25, %s309_s25 }
  0x70   : > { %p4088_p4 = scmp.ne.s32.totalorder %s309_s25, %s4087_s20  ;;  %p4096_p10 = scmp.lt.s32.totalorder %s4087_s20, %s4087_s20 }
  0x72   : > { %p4090_p6 = pnand %p4088_p4, %p4252_p7  ;;  %p4097_p11 = por %p4096_p10, %p4095_p9 }
  0x74   : > { %p4091_p8 = pneg %p4090_p6 }
  0x76   : > { %p4098_p12 = pnand %p4097_p11, %p4091_p8 }
  0x78   : > { %4101 = shalt.err (!%p4098_p12)
}
  0x79   : > { %3927 = dma.hbm_to_vmem [thread:$0]  (!%p4236_p5), %s4788_s5, 10240, %s309_s25, [#allocation8], %s4158_s23, %s4158_s23, %s4159_s24  }
  0x7a   : > { %s4102_s28 = scalar_lea.hbm %s4789_s6, 128 }
  0x7b   : > { %p4103_p2 = scmp.ne.s32.totalorder %s4789_s6, %s4102_s28  ;;  %p4109_p0 = scmp.lt.u32.totalorder %s4102_s28, %s4789_s6 }
  0x7d   : > { %p4105_p3 = pnand %p4103_p2, %p4252_p7 }
  0x7f   : > { %p4106_p13 = pneg %p4105_p3 }
  0x81   : > { %p4111_p1 = pnand %p4109_p0, %p4106_p13 }
  0x83   : > { %4114 = shalt.err (!%p4111_p1)
}
  0x84   : > { %s4115_s19 = scalar_lea.vmem %s323_s27, 128  ;;  %p4123_p9 = scmp.lt.s32.totalorder %s323_s27, %s323_s27 }
  0x85   : > { %p4116_p4 = scmp.ne.s32.totalorder %s323_s27, %s4115_s19  ;;  %p4124_p10 = scmp.lt.s32.totalorder %s4115_s19, %s4115_s19 }
  0x87   : > { %p4118_p6 = pnand %p4116_p4, %p4252_p7  ;;  %p4125_p11 = por %p4124_p10, %p4123_p9 }
  0x89   : > { %p4119_p8 = pneg %p4118_p6 }
  0x8b   : > { %p4126_p12 = pnand %p4125_p11, %p4119_p8 }
  0x8d   : > { %4129 = shalt.err (!%p4126_p12)
}
  0x8e   : > { %3930 = dma.hbm_to_vmem [thread:$0]  (!%p4236_p5), %s4789_s6, 128, %s323_s27, [#allocation11]  }
  0x8f   : > { %p4798_p2 = scmp.ne.s32.totalorder %s4795_s13, 0 }
  0x90   : > { %p4799_p3 = scmp.eq.s32.totalorder (!%p4798_p2), %s4219_s12, 0 }
  0x91   : > { %349 = sbr.rel (%p4798_p2) target bundleno = 689 (0x2b1), region = 56 }
  0x98   : > { %4135 = dma.done.wait (%p4799_p3), [#allocation3], 2048   ;;  %p4800_p7 = pmov %p4799_p3 }
  0x99   : > { %p4801_p13 = pmov %p4799_p3 }
  0x9a   : > { %4137 = vsyncadd (%p4800_p7), [#allocation3], 4294965248 }
  0x9b   : > { %4139 = dma.done.wait (%p4801_p13), [#allocation5], 6272   ;;  %p4802_p0 = pmov %p4799_p3 }
  0x9d   : > { %4141 = vsyncadd (%p4802_p0), [#allocation5], 4294961024  ;;  %p4803_p1 = pmov %p4802_p0 }
  0x9e   : > { %p4804_p5 = pmov %p4802_p0 }
  0x9f   : > { %4143 = dma.done.wait (%p4803_p1), [#allocation8], 10368  }
  0xa0   : > { %4145 = vsyncadd (%p4804_p5), [#allocation8], 4294956928  ;;  %p4805_p4 = pmov %p4802_p0 }
  0xa1   : > { %p4806_p6 = pmov %p4802_p0 }
  0xa2   : > { %4147 = dma.done.wait (%p4805_p4), [#allocation11], 128  }
  0xa3   : > { %4149 = vsyncadd (%p4806_p6), [#allocation11], 4294967168  ;;  %p404_p8 = scmp.lt.s32.totalorder %s4219_s12, 1  ;;  %v4162_v0 = vmov 0   ;;  %v420_v1 = vld [vmem:[#allocation2] sm:$0xff]  ;;  %v421_v3 = vld [vmem:[#allocation2 + $0x8] sm:$0xff] }
  0xa4   : > { %596 = vmatprep.mubr.bf16.mxu0 %v4162_v0  ;;  %637 = vmatprep.mubr.bf16.mxu1 %v4162_v0  ;;  %v424_v2 = vld [vmem:[#allocation2 + $0x20] sm:$0xff]  ;;  %v425_v5 = vld [vmem:[#allocation2 + $0x28] sm:$0xff]  ;;  %v422_v17 = vld [vmem:[#allocation2 + $0x10] sm:$0xff]  ;;  %vm560_vm0 = vcmask 261120   ;;  %vm3563_vm3 = vcmask 15360  }
  0xa5   : > { %s4808_s12 = smov (!%p404_p8, %s4219_s12), 1  ;;  %v3701_v4 = vcombine.high %v420_v1, %v424_v2  ;;  %v3700_v6 = vcombine.low %v420_v1, %v424_v2  ;;  %v428_v7 = vld [vmem:[#allocation2 + $0x40] sm:$0xff]  ;;  %v3703_v9 = vcombine.high %v421_v3, %v425_v5  ;;  %v3702_v10 = vcombine.low %v421_v3, %v425_v5  ;;  %v429_v12 = vld [vmem:[#allocation2 + $0x48] sm:$0xff]  ;;  %v426_v18 = vld [vmem:[#allocation2 + $0x30] sm:$0xff] }
  0xa6   : > { %s3887_s13 = sshll.u32 %s4808_s12, 3  ;;  %v432_v8 = vld [vmem:[#allocation2 + $0x60] sm:$0xff]  ;;  %v433_v13 = vld [vmem:[#allocation2 + $0x68] sm:$0xff]  ;;  %v423_v21 = vld [vmem:[#allocation2 + $0x18] sm:$0xff]  ;;  %v3705_v24 = vcombine.high %v422_v17, %v426_v18  ;;  %v3704_v31 = vcombine.low %v422_v17, %v426_v18 }
  0xa7   : > { %s408_s25 = scalar_lea.vmem %s4783_s0, %s3887_s13  ;;  %v3709_v11 = vcombine.high %v428_v7, %v432_v8  ;;  %564 = vmatprep.subr.bf16.mxu0 %v3701_v4  ;;  %v3711_v15 = vcombine.high %v429_v12, %v433_v13  ;;  %605 = vmatprep.subr.bf16.mxu1 %v3703_v9  ;;  %v3708_v19 = vcombine.low %v428_v7, %v432_v8  ;;  %v427_v22 = vld [vmem:[#allocation2 + $0x38] sm:$0xff]  ;;  %v430_v26 = vld [vmem:[#allocation2 + $0x50] sm:$0xff]  ;;  %v937_v35 = vld [vmem:[#allocation6 + $0x80] sm:$0xff]  ;;  %s412_s26 = scalar_lea.vmem %s4792_s9, %s3887_s13 }
  0xa8   : > { %v4413_v14 = vld [vmem:[%s408_s25] sm:$0xf]  ;;  %v415_v16 = vld [vmem:[%s408_s25 + $0x4] sm:$0x3]  ;;  %565 = vmatpush1.bf16.msra.mxu0 %v3700_v6  ;;  %606 = vmatpush1.bf16.msra.mxu1 %v3702_v10  ;;  %v3710_v23 = vcombine.low %v429_v12, %v433_v13  ;;  %v3707_v25 = vcombine.high %v423_v21, %v427_v22  ;;  %v431_v29 = vld [vmem:[#allocation2 + $0x58] sm:$0xff]  ;;  %v3706_v32 = vcombine.low %v423_v21, %v427_v22 }
  0xa9   : > { %v4416_v20 = vcombine.low %v4413_v14, %v415_v16  ;;  %566 = vmatprep.subr.bf16.mxu0 %v3709_v11  ;;  %607 = vmatprep.subr.bf16.mxu1 %v3711_v15  ;;  %v434_v27 = vld [vmem:[#allocation2 + $0x70] sm:$0xff]  ;;  %v435_v30 = vld [vmem:[#allocation2 + $0x78] sm:$0xff]  ;;  %v941_v36 = vld [vmem:[#allocation6 + $0xa0] sm:$0xff] }
  0xaa   : > { %v3713_v33 = vcombine.high %v430_v26, %v434_v27  ;;  %v3715_v34 = vcombine.high %v431_v29, %v435_v30  ;;  %v938_v37 = vld [vmem:[#allocation6 + $0x88] sm:$0xff]  ;;  %v3712_v39 = vcombine.low %v430_v26, %v434_v27  ;;  %v3714_v40 = vcombine.low %v431_v29, %v435_v30  ;;  %v945_v43 = vld [vmem:[#allocation6 + $0xc0] sm:$0xff]  ;;  %v939_v51 = vld [vmem:[#allocation6 + $0x90] sm:$0xff] }
  0xab   : > { %v4419_v28 = vrot.slane %v4416_v20, 1  ;;  %v942_v38 = vld [vmem:[#allocation6 + $0xa8] sm:$0xff]  ;;  %v3721_v41 = vcombine.high %v937_v35, %v941_v36  ;;  %v949_v44 = vld [vmem:[#allocation6 + $0xe0] sm:$0xff]  ;;  %v3720_v47 = vcombine.low %v937_v35, %v941_v36  ;;  %v943_v52 = vld [vmem:[#allocation6 + $0xb0] sm:$0xff]  ;;  %v1200_v17 = vshll.u32 %v4416_v20, 16 }
  0xac   : > { %567 = vmatpush1.bf16.msra.mxu0 %v3708_v19  ;;  %608 = vmatpush1.bf16.msra.mxu1 %v3710_v23  ;;  %v3723_v42 = vcombine.high %v938_v37, %v942_v38  ;;  %v946_v45 = vld [vmem:[#allocation6 + $0xc8] sm:$0xff]  ;;  %v3722_v48 = vcombine.low %v938_v37, %v942_v38  ;;  %v3729_v49 = vcombine.high %v945_v43, %v949_v44  ;;  %v940_v53 = vld [vmem:[#allocation6 + $0x98] sm:$0xff]  ;;  %v947_v59 = vld [vmem:[#allocation6 + $0xd0] sm:$0xff] }
  0xad   : > { %646 = vmatprep.subr.bf16.mxu0 %v3705_v24  ;;  %687 = vmatprep.subr.bf16.mxu1 %v3707_v25  ;;  %v950_v46 = vld [vmem:[#allocation6 + $0xe8] sm:$0xff]  ;;  %v944_v54 = vld [vmem:[#allocation6 + $0xb8] sm:$0xff]  ;;  %v3728_v55 = vcombine.low %v945_v43, %v949_v44  ;;  %v3725_v57 = vcombine.high %v939_v51, %v943_v52  ;;  %v951_v60 = vld [vmem:[#allocation6 + $0xf0] sm:$0xff]  ;;  %v3724_v63 = vcombine.low %v939_v51, %v943_v52  ;;  %v1198_v25 = vshrl.u32 %v4416_v20, 16 }
  0xae   : > { %v3731_v50 = vcombine.high %v946_v45, %v950_v46  ;;  %v3730_v56 = vcombine.low %v946_v45, %v950_v46  ;;  %v3727_v58 = vcombine.high %v940_v53, %v944_v54  ;;  %v948_v61 = vld [vmem:[#allocation6 + $0xd8] sm:$0xff]  ;;  %v3726_v1 = vcombine.low %v940_v53, %v944_v54  ;;  %v920_v4 = vld [vmem:[#allocation6] sm:$0xff]  ;;  %v921_v6 = vld [vmem:[#allocation6 + $0x8] sm:$0xff] }
  0xaf   : > { %3716 = vmatmul.mubr.msk.bf16.vlgmr.msra.gmra.mrb[0].mxu0 %vm560_vm0, %v4419_v28  ;;  %3717 = vmatmul.mubr.msk.bf16.vlgmr.msra.gmra.mrb[0].mxu1 %vm560_vm0, %v4419_v28  ;;  %v952_v62 = vld [vmem:[#allocation6 + $0xf8] sm:$0xff]  ;;  %v3733_v2 = vcombine.high %v947_v59, %v951_v60  ;;  %v924_v5 = vld [vmem:[#allocation6 + $0x20] sm:$0xff]  ;;  %v925_v7 = vld [vmem:[#allocation6 + $0x28] sm:$0xff]  ;;  %v3732_v8 = vcombine.low %v947_v59, %v951_v60  ;;  %v1202_v26 = vrot.slane %v1200_v17, 1 }
  0xb0   : > { %647 = vmatpush1.bf16.msra.mxu0 %v3704_v31  ;;  %688 = vmatpush1.bf16.msra.mxu1 %v3706_v32  ;;  %v3735_v3 = vcombine.high %v948_v61, %v952_v62  ;;  %v3734_v9 = vcombine.low %v948_v61, %v952_v62  ;;  %v3741_v10 = vcombine.high %v920_v4, %v924_v5  ;;  %v928_v12 = vld [vmem:[#allocation6 + $0x40] sm:$0xff]  ;;  %v929_v15 = vld [vmem:[#allocation6 + $0x48] sm:$0xff]  ;;  %v922_v23 = vld [vmem:[#allocation6 + $0x10] sm:$0xff]  ;;  %v1468_v61 = vrot.slane %v1198_v25, 1 }
  0xb1   : > { %648 = vmatprep.subr.bf16.mxu0 %v3713_v33  ;;  %689 = vmatprep.subr.bf16.mxu1 %v3715_v34  ;;  %v3743_v11 = vcombine.high %v921_v6, %v925_v7  ;;  %v932_v13 = vld [vmem:[#allocation6 + $0x60] sm:$0xff]  ;;  %v933_v16 = vld [vmem:[#allocation6 + $0x68] sm:$0xff]  ;;  %v3740_v18 = vcombine.low %v920_v4, %v924_v5  ;;  %v3742_v19 = vcombine.low %v921_v6, %v925_v7  ;;  %v926_v24 = vld [vmem:[#allocation6 + $0x30] sm:$0xff]  ;;  %v1469_v62 = vrot.slane %v1200_v17, 2 }
  0xb2   : > { %678 = vmatprep.mubr.bf16.mxu0 %v4162_v0  ;;  %719 = vmatprep.mubr.bf16.mxu1 %v4162_v0  ;;  %v3749_v21 = vcombine.high %v928_v12, %v932_v13  ;;  %v3751_v22 = vcombine.high %v929_v15, %v933_v16  ;;  %v923_v27 = vld [vmem:[#allocation6 + $0x18] sm:$0xff]  ;;  %v3748_v30 = vcombine.low %v928_v12, %v932_v13  ;;  %v930_v34 = vld [vmem:[#allocation6 + $0x50] sm:$0xff]  ;;  %v1452_v43 = vld [vmem:[#allocation6 + $0x100] sm:$0xff] }
  0xb3   : > { %v927_v29 = vld [vmem:[#allocation6 + $0x38] sm:$0xff]  ;;  %v3750_v31 = vcombine.low %v929_v15, %v933_v16  ;;  %v3745_v32 = vcombine.high %v922_v23, %v926_v24  ;;  %v934_v35 = vld [vmem:[#allocation6 + $0x70] sm:$0xff]  ;;  %v4449_v36 = vor.u32 %v1202_v26, %v1198_v25  ;;  %v1456_v44 = vld [vmem:[#allocation6 + $0x120] sm:$0xff] }
  0xb4   : > { %649 = vmatpush1.bf16.msra.mxu0 %v3712_v39  ;;  %690 = vmatpush1.bf16.msra.mxu1 %v3714_v40  ;;  %v3747_v33 = vcombine.high %v923_v27, %v927_v29  ;;  %v931_v37 = vld [vmem:[#allocation6 + $0x58] sm:$0xff]  ;;  %v3744_v39 = vcombine.low %v922_v23, %v926_v24  ;;  %v3746_v40 = vcombine.low %v923_v27, %v927_v29  ;;  %v1453_v45 = vld [vmem:[#allocation6 + $0x108] sm:$0xff]  ;;  %v1460_v51 = vld [vmem:[#allocation6 + $0x140] sm:$0xff] }
  0xb5   : > { %1033 = vmatprep.subr.bf16.mxu0 %v3721_v41  ;;  %1074 = vmatprep.subr.bf16.mxu1 %v3723_v42  ;;  %v935_v38 = vld [vmem:[#allocation6 + $0x78] sm:$0xff]  ;;  %v3753_v41 = vcombine.high %v930_v34, %v934_v35  ;;  %v1457_v46 = vld [vmem:[#allocation6 + $0x128] sm:$0xff]  ;;  %v1464_v52 = vld [vmem:[#allocation6 + $0x160] sm:$0xff] }
  0xb6   : > { %v3755_v42 = vcombine.high %v931_v37, %v935_v38  ;;  %v1461_v53 = vld [vmem:[#allocation6 + $0x148] sm:$0xff]  ;;  %v1454_v59 = vld [vmem:[#allocation6 + $0x110] sm:$0xff] }
  0xb7   : > { %3718 = vmatmul.mubr.msk.bf16.vlgmr.msra.gmra.mrb[4].mxu0 %vm560_vm0, %v4419_v28  ;;  %3719 = vmatmul.mubr.msk.bf16.vlgmr.msra.gmra.mrb[4].mxu1 %vm560_vm0, %v4419_v28  ;;  %v1465_v54 = vld [vmem:[#allocation6 + $0x168] sm:$0xff]  ;;  %v1458_v60 = vld [vmem:[#allocation6 + $0x130] sm:$0xff] }
  0xb8   : > { %1034 = vmatpush1.bf16.msra.mxu0 %v3720_v47  ;;  %1075 = vmatpush1.bf16.msra.mxu1 %v3722_v48  ;;  %v3752_v47 = vcombine.low %v930_v34, %v934_v35  ;;  %v3754_v48 = vcombine.low %v931_v37, %v935_v38  ;;  %v3765_v4 = vcombine.high %v1454_v59, %v1458_v60  ;;  %v1462_v6 = vld [vmem:[#allocation6 + $0x150] sm:$0xff]  ;;  %v1986_v16 = vld [vmem:[#allocation9 + $0x80] sm:$0xff]  ;;  %v1988_v34 = vld [vmem:[#allocation9 + $0x90] sm:$0xff] }
  0xb9   : > { %1035 = vmatprep.subr.bf16.mxu0 %v3729_v49  ;;  %1076 = vmatprep.subr.bf16.mxu1 %v3731_v50  ;;  %v3761_v49 = vcombine.high %v1452_v43, %v1456_v44  ;;  %v3763_v50 = vcombine.high %v1453_v45, %v1457_v46  ;;  %v1466_v7 = vld [vmem:[#allocation6 + $0x170] sm:$0xff]  ;;  %v1990_v17 = vld [vmem:[#allocation9 + $0xa0] sm:$0xff]  ;;  %v1992_v35 = vld [vmem:[#allocation9 + $0xb0] sm:$0xff] }
  0xba   : > { %1065 = vmatprep.mubr.bf16.mxu0 %v4162_v0  ;;  %1106 = vmatprep.mubr.bf16.mxu1 %v4162_v0  ;;  %v3773_v13 = vcombine.high %v1462_v6, %v1466_v7  ;;  %v3783_v23 = vcombine.high %v1986_v16, %v1990_v17  ;;  %v1994_v25 = vld [vmem:[#allocation9 + $0xc0] sm:$0xff]  ;;  %v1995_v27 = vld [vmem:[#allocation9 + $0xc8] sm:$0xff]  ;;  %v1989_v37 = vld [vmem:[#allocation9 + $0x98] sm:$0xff] }
  0xbb   : > { %v1998_v26 = vld [vmem:[#allocation9 + $0xe0] sm:$0xff]  ;;  %v1999_v29 = vld [vmem:[#allocation9 + $0xe8] sm:$0xff]  ;;  %v1993_v38 = vld [vmem:[#allocation9 + $0xb8] sm:$0xff] }
  0xbc   : > { %1036 = vmatpush1.bf16.msra.mxu0 %v3728_v55  ;;  %1077 = vmatpush1.bf16.msra.mxu1 %v3730_v56  ;;  %v3760_v55 = vcombine.low %v1452_v43, %v1456_v44  ;;  %v3762_v56 = vcombine.low %v1453_v45, %v1457_v46  ;;  %v1996_v43 = vld [vmem:[#allocation9 + $0xd0] sm:$0xff]  ;;  %v1997_v45 = vld [vmem:[#allocation9 + $0xd8] sm:$0xff] }
  0xbd   : > { %1115 = vmatprep.subr.bf16.mxu0 %v3725_v57  ;;  %1156 = vmatprep.subr.bf16.mxu1 %v3727_v58  ;;  %v3769_v57 = vcombine.high %v1460_v51, %v1464_v52  ;;  %v3771_v58 = vcombine.high %v1461_v53, %v1465_v54  ;;  %v2000_v44 = vld [vmem:[#allocation9 + $0xf0] sm:$0xff]  ;;  %v2001_v46 = vld [vmem:[#allocation9 + $0xf8] sm:$0xff] }
  0xbf   : > { %3736 = vmatmul.mubr.msk.bf16.vlgmr.msra.gmra.mrb[8].mxu0 %vm560_vm0, %v4419_v28  ;;  %3737 = vmatmul.mubr.msk.bf16.vlgmr.msra.gmra.mrb[8].mxu1 %vm560_vm0, %v4419_v28 }
  0xc0   : > { %1116 = vmatpush1.bf16.msra.mxu0 %v3724_v63  ;;  %1157 = vmatpush1.bf16.msra.mxu1 %v3726_v1  ;;  %v1455_v63 = vld [vmem:[#allocation6 + $0x118] sm:$0xff] }
  0xc1   : > { %1117 = vmatprep.subr.bf16.mxu0 %v3733_v2  ;;  %1158 = vmatprep.subr.bf16.mxu1 %v3735_v3  ;;  %v1459_v1 = vld [vmem:[#allocation6 + $0x138] sm:$0xff]  ;;  %v3768_v2 = vcombine.low %v1460_v51, %v1464_v52  ;;  %v3770_v3 = vcombine.low %v1461_v53, %v1465_v54  ;;  %v1969_v51 = vld [vmem:[#allocation9] sm:$0xff]  ;;  %v1970_v53 = vld [vmem:[#allocation9 + $0x8] sm:$0xff] }
  0xc2   : > { %1147 = vmatprep.mubr.bf16.mxu0 %v4162_v0  ;;  %1188 = vmatprep.mubr.bf16.mxu1 %v4162_v0  ;;  %v3767_v5 = vcombine.high %v1455_v63, %v1459_v1  ;;  %v3766_v12 = vcombine.low %v1455_v63, %v1459_v1  ;;  %v1973_v52 = vld [vmem:[#allocation9 + $0x20] sm:$0xff]  ;;  %v1974_v54 = vld [vmem:[#allocation9 + $0x28] sm:$0xff] }
  0xc3   : > { %v3802_v63 = vcombine.low %v1969_v51, %v1973_v52  ;;  %v3804_v1 = vcombine.low %v1970_v53, %v1974_v54 }
  0xc4   : > { %1118 = vmatpush1.bf16.msra.mxu0 %v3732_v8  ;;  %1159 = vmatpush1.bf16.msra.mxu1 %v3734_v9  ;;  %v4465_v8 = vor.u32 %v1469_v62, %v1468_v61  ;;  %v1463_v9 = vld [vmem:[#allocation6 + $0x158] sm:$0xff]  ;;  %v1978_v61 = vld [vmem:[#allocation9 + $0x48] sm:$0xff] }
  0xc5   : > { %1287 = vmatprep.subr.bf16.mxu0 %v3741_v10  ;;  %1328 = vmatprep.subr.bf16.mxu1 %v3743_v11  ;;  %v1467_v10 = vld [vmem:[#allocation6 + $0x178] sm:$0xff]  ;;  %v3764_v11 = vcombine.low %v1454_v59, %v1458_v60  ;;  %v1977_v59 = vld [vmem:[#allocation9 + $0x40] sm:$0xff]  ;;  %v1982_v62 = vld [vmem:[#allocation9 + $0x68] sm:$0xff] }
  0xc6   : > { %v3775_v15 = vcombine.high %v1463_v9, %v1467_v10  ;;  %v1981_v60 = vld [vmem:[#allocation9 + $0x60] sm:$0xff] }
  0xc7   : > { %3738 = vmatmul.mubr.msk.bf16.vlgmr.msra.gmra.mrb[12].mxu0 %vm560_vm0, %v4419_v28  ;;  %3739 = vmatmul.mubr.msk.bf16.vlgmr.msra.gmra.mrb[12].mxu1 %vm560_vm0, %v4419_v28 }
  0xc8   : > { %1288 = vmatpush1.bf16.msra.mxu0 %v3740_v18  ;;  %1329 = vmatpush1.bf16.msra.mxu1 %v3742_v19  ;;  %v1987_v18 = vld [vmem:[#allocation9 + $0x88] sm:$0xff] }
  0xc9   : > { %1289 = vmatprep.subr.bf16.mxu0 %v3749_v21  ;;  %1330 = vmatprep.subr.bf16.mxu1 %v3751_v22  ;;  %v1991_v19 = vld [vmem:[#allocation9 + $0xa8] sm:$0xff]  ;;  %v3772_v21 = vcombine.low %v1462_v6, %v1466_v7  ;;  %v3774_v22 = vcombine.low %v1463_v9, %v1467_v10  ;;  %v1972_v6 = vld [vmem:[#allocation9 + $0x18] sm:$0xff]  ;;  %v3810_v9 = vcombine.low %v1977_v59, %v1981_v60 }
  0xca   : > { %1319 = vmatprep.mubr.bf16.mxu0 %v4162_v0  ;;  %1360 = vmatprep.mubr.bf16.mxu1 %v4162_v0  ;;  %v3785_v24 = vcombine.high %v1987_v18, %v1991_v19  ;;  %v1976_v7 = vld [vmem:[#allocation9 + $0x38] sm:$0xff]  ;;  %v3812_v10 = vcombine.low %v1978_v61, %v1982_v62 }
  0xcc   : > { %1290 = vmatpush1.bf16.msra.mxu0 %v3748_v30  ;;  %1331 = vmatpush1.bf16.msra.mxu1 %v3750_v31  ;;  %v3782_v30 = vcombine.low %v1986_v16, %v1990_v17  ;;  %v3784_v31 = vcombine.low %v1987_v18, %v1991_v19  ;;  %v3698_v16 = vcombine.low %v4413_v14, %v4413_v14  ;;  %v1980_v17 = vld [vmem:[#allocation9 + $0x58] sm:$0xff] }
  0xcd   : > { %1369 = vmatprep.subr.bf16.mxu0 %v3745_v32  ;;  %1410 = vmatprep.subr.bf16.mxu1 %v3747_v33  ;;  %v3791_v32 = vcombine.high %v1994_v25, %v1998_v26  ;;  %v3793_v33 = vcombine.high %v1995_v27, %v1999_v29  ;;  %v1984_v18 = vld [vmem:[#allocation9 + $0x78] sm:$0xff]  ;;  %v3808_v19 = vcombine.low %v1972_v6, %v1976_v7 }
  0xcf   : > { %3756 = vmatmul.mubr.msk.bf16.vlgmr.msra.gmra.mrb[16].mxu0 %vm560_vm0, %v4449_v36  ;;  %3757 = vmatmul.mubr.msk.bf16.vlgmr.msra.gmra.mrb[16].mxu1 %vm560_vm0, %v4449_v36 }
  0xd0   : > { %1370 = vmatpush1.bf16.msra.mxu0 %v3744_v39  ;;  %1411 = vmatpush1.bf16.msra.mxu1 %v3746_v40  ;;  %v3790_v39 = vcombine.low %v1994_v25, %v1998_v26  ;;  %v3792_v40 = vcombine.low %v1995_v27, %v1999_v29  ;;  %v2495_v25 = vld [vmem:[#allocation9 + $0x108] sm:$0xff]  ;;  %v3816_v27 = vcombine.low %v1980_v17, %v1984_v18 }
  0xd1   : > { %1371 = vmatprep.subr.bf16.mxu0 %v3753_v41  ;;  %1412 = vmatprep.subr.bf16.mxu1 %v3755_v42  ;;  %v3787_v41 = vcombine.high %v1988_v34, %v1992_v35  ;;  %v3789_v42 = vcombine.high %v1989_v37, %v1993_v38  ;;  %v2499_v26 = vld [vmem:[#allocation9 + $0x128] sm:$0xff] }
  0xd2   : > { %1401 = vmatprep.mubr.bf16.mxu0 %v4162_v0  ;;  %1442 = vmatprep.mubr.bf16.mxu1 %v4162_v0 }
  0xd4   : > { %1372 = vmatpush1.bf16.msra.mxu0 %v3752_v47  ;;  %1413 = vmatpush1.bf16.msra.mxu1 %v3754_v48  ;;  %v3786_v47 = vcombine.low %v1988_v34, %v1992_v35  ;;  %v3788_v48 = vcombine.low %v1989_v37, %v1993_v38  ;;  %v2507_v34 = vld [vmem:[#allocation9 + $0x168] sm:$0xff]  ;;  %v3824_v37 = vcombine.low %v2495_v25, %v2499_v26 }
  0xd5   : > { %1554 = vmatprep.subr.bf16.mxu0 %v3761_v49  ;;  %1595 = vmatprep.subr.bf16.mxu1 %v3763_v50  ;;  %v3795_v49 = vcombine.high %v1996_v43, %v2000_v44  ;;  %v3797_v50 = vcombine.high %v1997_v45, %v2001_v46 }
  0xd7   : > { %3758 = vmatmul.mubr.msk.bf16.vlgmr.msra.gmra.mrb[20].mxu0 %vm560_vm0, %v4449_v36  ;;  %3759 = vmatmul.mubr.msk.bf16.vlgmr.msra.gmra.mrb[20].mxu1 %vm560_vm0, %v4449_v36 }
  0xd8   : > { %1555 = vmatpush1.bf16.msra.mxu0 %v3760_v55  ;;  %1596 = vmatpush1.bf16.msra.mxu1 %v3762_v56  ;;  %v3794_v55 = vcombine.low %v1996_v43, %v2000_v44  ;;  %v3796_v56 = vcombine.low %v1997_v45, %v2001_v46  ;;  %v2501_v43 = vld [vmem:[#allocation9 + $0x138] sm:$0xff] }
  0xd9   : > { %1556 = vmatprep.subr.bf16.mxu0 %v3769_v57  ;;  %1597 = vmatprep.subr.bf16.mxu1 %v3771_v58  ;;  %v3803_v57 = vcombine.high %v1969_v51, %v1973_v52  ;;  %v3805_v58 = vcombine.high %v1970_v53, %v1974_v54  ;;  %v2509_v51 = vld [vmem:[#allocation9 + $0x178] sm:$0xff] }
  0xda   : > { %1586 = vmatprep.mubr.bf16.mxu0 %v4162_v0  ;;  %1627 = vmatprep.mubr.bf16.mxu1 %v4162_v0 }
  0xdc   : > { %1557 = vmatpush1.bf16.msra.mxu0 %v3768_v2  ;;  %1598 = vmatpush1.bf16.msra.mxu1 %v3770_v3  ;;  %v3811_v2 = vcombine.high %v1977_v59, %v1981_v60  ;;  %v3813_v3 = vcombine.high %v1978_v61, %v1982_v62  ;;  %v2768_v59 = vld [vmem:[#allocation9 + $0x1a8] sm:$0xff] }
  0xdd   : > { %1636 = vmatprep.subr.bf16.mxu0 %v3765_v4  ;;  %1677 = vmatprep.subr.bf16.mxu1 %v3767_v5  ;;  %v1971_v4 = vld [vmem:[#allocation9 + $0x10] sm:$0xff] }
  0xde   : > { %v1975_v5 = vld [vmem:[#allocation9 + $0x30] sm:$0xff] }
  0xdf   : > { %3776 = vmatmul.mubr.msk.bf16.vlgmr.msra.gmra.mrb[24].mxu0 %vm560_vm0, %v4465_v8  ;;  %3777 = vmatmul.mubr.msk.bf16.vlgmr.msra.gmra.mrb[24].mxu1 %vm560_vm0, %v4465_v8 }
  0xe0   : > { %1637 = vmatpush1.bf16.msra.mxu0 %v3764_v11  ;;  %1678 = vmatpush1.bf16.msra.mxu1 %v3766_v12  ;;  %v3807_v11 = vcombine.high %v1971_v4, %v1975_v5  ;;  %v3809_v12 = vcombine.high %v1972_v6, %v1976_v7 }
  0xe1   : > { %1638 = vmatprep.subr.bf16.mxu0 %v3773_v13  ;;  %1679 = vmatprep.subr.bf16.mxu1 %v3775_v15  ;;  %v1979_v13 = vld [vmem:[#allocation9 + $0x50] sm:$0xff] }
  0xe2   : > { %1668 = vmatprep.mubr.bf16.mxu0 %v4162_v0  ;;  %1709 = vmatprep.mubr.bf16.mxu1 %v4162_v0  ;;  %v1983_v15 = vld [vmem:[#allocation9 + $0x70] sm:$0xff] }
  0xe3   : > { %v3814_v14 = vcombine.low %v1979_v13, %v1983_v15 }
  0xe4   : > { %1639 = vmatpush1.bf16.msra.mxu0 %v3772_v21  ;;  %1680 = vmatpush1.bf16.msra.mxu1 %v3774_v22  ;;  %v3815_v21 = vcombine.high %v1979_v13, %v1983_v15  ;;  %v3817_v22 = vcombine.high %v1980_v17, %v1984_v18  ;;  %v2770_v13 = vld [vmem:[#allocation9 + $0x1b8] sm:$0xff] }
  0xe5   : > { %2082 = vmatprep.subr.bf16.mxu0 %v3783_v23  ;;  %2123 = vmatprep.subr.bf16.mxu1 %v3785_v24  ;;  %v2494_v23 = vld [vmem:[#allocation9 + $0x100] sm:$0xff] }
  0xe6   : > { %v2498_v24 = vld [vmem:[#allocation9 + $0x120] sm:$0xff] }
  0xe7   : > { %3778 = vmatmul.mubr.msk.bf16.vlgmr.msra.gmra.mrb[28].mxu0 %vm560_vm0, %v4465_v8  ;;  %3779 = vmatmul.mubr.msk.bf16.vlgmr.msra.gmra.mrb[28].mxu1 %vm560_vm0, %v4465_v8  ;;  %v3823_v29 = vcombine.high %v2494_v23, %v2498_v24  ;;  %v3822_v35 = vcombine.low %v2494_v23, %v2498_v24 }
  0xe8   : > { %2083 = vmatpush1.bf16.msra.mxu0 %v3782_v30  ;;  %2124 = vmatpush1.bf16.msra.mxu1 %v3784_v31  ;;  %v3825_v30 = vcombine.high %v2495_v25, %v2499_v26  ;;  %v2502_v31 = vld [vmem:[#allocation9 + $0x140] sm:$0xff] }
  0xe9   : > { %2084 = vmatprep.subr.bf16.mxu0 %v3791_v32  ;;  %2125 = vmatprep.subr.bf16.mxu1 %v3793_v33  ;;  %v2506_v32 = vld [vmem:[#allocation9 + $0x160] sm:$0xff]  ;;  %v2503_v33 = vld [vmem:[#allocation9 + $0x148] sm:$0xff] }
  0xea   : > { %2114 = vmatprep.mubr.bf16.mxu0 %v4162_v0  ;;  %2155 = vmatprep.mubr.bf16.mxu1 %v4162_v0  ;;  %v3831_v38 = vcombine.high %v2502_v31, %v2506_v32  ;;  %v3830_v44 = vcombine.low %v2502_v31, %v2506_v32  ;;  %v3832_v45 = vcombine.low %v2503_v33, %v2507_v34  ;;  %v3032_v26 = vld [vmem:[#allocation9 + $0x200] sm:$0xff] }
  0xec   : > { %2085 = vmatpush1.bf16.msra.mxu0 %v3790_v39  ;;  %2126 = vmatpush1.bf16.msra.mxu1 %v3792_v40  ;;  %v3833_v39 = vcombine.high %v2503_v33, %v2507_v34  ;;  %v2496_v40 = vld [vmem:[#allocation9 + $0x110] sm:$0xff]  ;;  %v3040_v34 = vld [vmem:[#allocation9 + $0x240] sm:$0xff] }
  0xed   : > { %2164 = vmatprep.subr.bf16.mxu0 %v3787_v41  ;;  %2205 = vmatprep.subr.bf16.mxu1 %v3789_v42  ;;  %v2500_v41 = vld [vmem:[#allocation9 + $0x130] sm:$0xff]  ;;  %v2497_v42 = vld [vmem:[#allocation9 + $0x118] sm:$0xff] }
  0xee   : > { %v3827_v46 = vcombine.high %v2496_v40, %v2500_v41  ;;  %v3826_v52 = vcombine.low %v2496_v40, %v2500_v41  ;;  %v3828_v53 = vcombine.low %v2497_v42, %v2501_v43 }
  0xef   : > { %3798 = vmatmul.mubr.msk.bf16.vlgmr.msra.gmra.mrb[32].mxu0 %vm560_vm0, %v4449_v36  ;;  %3799 = vmatmul.mubr.msk.bf16.vlgmr.msra.gmra.mrb[32].mxu1 %vm560_vm0, %v4449_v36 }
  0xf0   : > { %2165 = vmatpush1.bf16.msra.mxu0 %v3786_v47  ;;  %2206 = vmatpush1.bf16.msra.mxu1 %v3788_v48  ;;  %v3829_v47 = vcombine.high %v2497_v42, %v2501_v43  ;;  %v2504_v48 = vld [vmem:[#allocation9 + $0x150] sm:$0xff] }
  0xf1   : > { %2166 = vmatprep.subr.bf16.mxu0 %v3795_v49  ;;  %2207 = vmatprep.subr.bf16.mxu1 %v3797_v50  ;;  %v2508_v49 = vld [vmem:[#allocation9 + $0x170] sm:$0xff]  ;;  %v2505_v50 = vld [vmem:[#allocation9 + $0x158] sm:$0xff] }
  0xf2   : > { %2196 = vmatprep.mubr.bf16.mxu0 %v4162_v0  ;;  %2237 = vmatprep.mubr.bf16.mxu1 %v4162_v0  ;;  %v3835_v54 = vcombine.high %v2504_v48, %v2508_v49  ;;  %v3834_v60 = vcombine.low %v2504_v48, %v2508_v49  ;;  %v3836_v61 = vcombine.low %v2505_v50, %v2509_v51  ;;  %v3034_v43 = vld [vmem:[#allocation9 + $0x210] sm:$0xff] }
  0xf4   : > { %2167 = vmatpush1.bf16.msra.mxu0 %v3794_v55  ;;  %2208 = vmatpush1.bf16.msra.mxu1 %v3796_v56  ;;  %v3837_v55 = vcombine.high %v2505_v50, %v2509_v51  ;;  %v2763_v56 = vld [vmem:[#allocation9 + $0x180] sm:$0xff]  ;;  %v3042_v51 = vld [vmem:[#allocation9 + $0x250] sm:$0xff] }
  0xf5   : > { %2329 = vmatprep.subr.bf16.mxu0 %v3803_v57  ;;  %2370 = vmatprep.subr.bf16.mxu1 %v3805_v58  ;;  %v2767_v57 = vld [vmem:[#allocation9 + $0x1a0] sm:$0xff]  ;;  %v2764_v58 = vld [vmem:[#allocation9 + $0x188] sm:$0xff] }
  0xf6   : > { %v3843_v62 = vcombine.high %v2763_v56, %v2767_v57  ;;  %v3844_v6 = vcombine.low %v2764_v58, %v2768_v59 }
  0xf7   : > { %3800 = vmatmul.mubr.msk.bf16.vlgmr.msra.gmra.mrb[36].mxu0 %vm560_vm0, %v4449_v36  ;;  %3801 = vmatmul.mubr.msk.bf16.vlgmr.msra.gmra.mrb[36].mxu1 %vm560_vm0, %v4449_v36  ;;  %v3806_v36 = vcombine.low %v1971_v4, %v1975_v5  ;;  %v2776_v4 = vld [vmem:[#allocation9 + $0x1e8] sm:$0xff]  ;;  %v3842_v5 = vcombine.low %v2763_v56, %v2767_v57 }
  0xf8   : > { %2330 = vmatpush1.bf16.msra.mxu0 %v3802_v63  ;;  %2371 = vmatpush1.bf16.msra.mxu1 %v3804_v1  ;;  %v3845_v63 = vcombine.high %v2764_v58, %v2768_v59  ;;  %v2771_v1 = vld [vmem:[#allocation9 + $0x1c0] sm:$0xff] }
  0xf9   : > { %2331 = vmatprep.subr.bf16.mxu0 %v3811_v2  ;;  %2372 = vmatprep.subr.bf16.mxu1 %v3813_v3  ;;  %v2775_v2 = vld [vmem:[#allocation9 + $0x1e0] sm:$0xff]  ;;  %v2772_v3 = vld [vmem:[#allocation9 + $0x1c8] sm:$0xff] }
  0xfa   : > { %2361 = vmatprep.mubr.bf16.mxu0 %v4162_v0  ;;  %2402 = vmatprep.mubr.bf16.mxu1 %v4162_v0  ;;  %v3851_v7 = vcombine.high %v2771_v1, %v2775_v2  ;;  %v3850_v15 = vcombine.low %v2771_v1, %v2775_v2  ;;  %v736_v1 = vld [vmem:[%s4790_s7] sm:$0xff] }
  0xfc   : > { %2332 = vmatpush1.bf16.msra.mxu0 %v3810_v9  ;;  %2373 = vmatpush1.bf16.msra.mxu1 %v3812_v10  ;;  %v3853_v9 = vcombine.high %v2772_v3, %v2776_v4  ;;  %v2765_v10 = vld [vmem:[#allocation9 + $0x190] sm:$0xff] }
  0xfd   : > { %2411 = vmatprep.subr.bf16.mxu0 %v3807_v11  ;;  %2452 = vmatprep.subr.bf16.mxu1 %v3809_v12  ;;  %v2769_v11 = vld [vmem:[#allocation9 + $0x1b0] sm:$0xff]  ;;  %v2766_v12 = vld [vmem:[#allocation9 + $0x198] sm:$0xff] }
  0xfe   : > { %v3847_v17 = vcombine.high %v2765_v10, %v2769_v11  ;;  %v3849_v18 = vcombine.high %v2766_v12, %v2770_v13  ;;  %v3846_v23 = vcombine.low %v2765_v10, %v2769_v11 }
  0xff   : > { %3818 = vmatmul.mubr.msk.bf16.vlgmr.msra.gmra.mrb[40].mxu0 %vm560_vm0, %v3698_v16  ;;  %3819 = vmatmul.mubr.msk.bf16.vlgmr.msra.gmra.mrb[40].mxu1 %vm560_vm0, %v3698_v16 }
 0x100   : > { %2412 = vmatpush1.bf16.msra.mxu0 %v3806_v36  ;;  %2453 = vmatpush1.bf16.msra.mxu1 %v3808_v19  ;;  %v2773_v36 = vld [vmem:[#allocation9 + $0x1d0] sm:$0xff] }
 0x101   : > { %2413 = vmatprep.subr.bf16.mxu0 %v3815_v21  ;;  %2454 = vmatprep.subr.bf16.mxu1 %v3817_v22  ;;  %v2777_v19 = vld [vmem:[#allocation9 + $0x1f0] sm:$0xff]  ;;  %v2774_v21 = vld [vmem:[#allocation9 + $0x1d8] sm:$0xff] }
 0x102   : > { %2443 = vmatprep.mubr.bf16.mxu0 %v4162_v0  ;;  %2484 = vmatprep.mubr.bf16.mxu1 %v4162_v0  ;;  %v2778_v22 = vld [vmem:[#allocation9 + $0x1f8] sm:$0xff]  ;;  %v3855_v24 = vcombine.high %v2773_v36, %v2777_v19 }
 0x103   : > { %v3857_v25 = vcombine.high %v2774_v21, %v2778_v22  ;;  %v3856_v31 = vcombine.low %v2774_v21, %v2778_v22 }
 0x104   : > { %2414 = vmatpush1.bf16.msra.mxu0 %v3814_v14  ;;  %2455 = vmatpush1.bf16.msra.mxu1 %v3816_v27  ;;  %v3036_v14 = vld [vmem:[#allocation9 + $0x220] sm:$0xff]  ;;  %v3033_v27 = vld [vmem:[#allocation9 + $0x208] sm:$0xff] }
 0x105   : > { %2590 = vmatprep.subr.bf16.mxu0 %v3823_v29  ;;  %2631 = vmatprep.subr.bf16.mxu1 %v3825_v30  ;;  %v3037_v29 = vld [vmem:[#allocation9 + $0x228] sm:$0xff]  ;;  %v3854_v30 = vcombine.low %v2773_v36, %v2777_v19  ;;  %v3863_v32 = vcombine.high %v3032_v26, %v3036_v14 }
 0x106   : > { %v3865_v33 = vcombine.high %v3033_v27, %v3037_v29  ;;  %v3864_v40 = vcombine.low %v3033_v27, %v3037_v29 }
 0x107   : > { %3820 = vmatmul.mubr.msk.bf16.vlgmr.msra.gmra.mrb[44].mxu0 %vm560_vm0, %v3698_v16  ;;  %3821 = vmatmul.mubr.msk.bf16.vlgmr.msra.gmra.mrb[44].mxu1 %vm560_vm0, %v3698_v16  ;;  %v3852_v16 = vcombine.low %v2772_v3, %v2776_v4 }
 0x108   : > { %2591 = vmatpush1.bf16.msra.mxu0 %v3822_v35  ;;  %2632 = vmatpush1.bf16.msra.mxu1 %v3824_v37  ;;  %v3044_v35 = vld [vmem:[#allocation9 + $0x260] sm:$0xff]  ;;  %v3041_v37 = vld [vmem:[#allocation9 + $0x248] sm:$0xff] }
 0x109   : > { %2592 = vmatprep.subr.bf16.mxu0 %v3831_v38  ;;  %2633 = vmatprep.subr.bf16.mxu1 %v3833_v39  ;;  %v3045_v38 = vld [vmem:[#allocation9 + $0x268] sm:$0xff]  ;;  %v3862_v39 = vcombine.low %v3032_v26, %v3036_v14  ;;  %v3871_v41 = vcombine.high %v3040_v34, %v3044_v35 }
 0x10a   : > { %2622 = vmatprep.mubr.bf16.mxu0 %v4162_v0  ;;  %2663 = vmatprep.mubr.bf16.mxu1 %v4162_v0  ;;  %v3873_v42 = vcombine.high %v3041_v37, %v3045_v38  ;;  %v3872_v48 = vcombine.low %v3041_v37, %v3045_v38 }
 0x10c   : > { %2593 = vmatpush1.bf16.msra.mxu0 %v3830_v44  ;;  %2634 = vmatpush1.bf16.msra.mxu1 %v3832_v45  ;;  %v3038_v44 = vld [vmem:[#allocation9 + $0x230] sm:$0xff]  ;;  %v3035_v45 = vld [vmem:[#allocation9 + $0x218] sm:$0xff] }
 0x10d   : > { %2672 = vmatprep.subr.bf16.mxu0 %v3827_v46  ;;  %2713 = vmatprep.subr.bf16.mxu1 %v3829_v47  ;;  %v3039_v46 = vld [vmem:[#allocation9 + $0x238] sm:$0xff]  ;;  %v3870_v47 = vcombine.low %v3040_v34, %v3044_v35  ;;  %v3867_v49 = vcombine.high %v3034_v43, %v3038_v44 }
 0x10e   : > { %v3869_v50 = vcombine.high %v3035_v45, %v3039_v46  ;;  %v3868_v56 = vcombine.low %v3035_v45, %v3039_v46 }
 0x10f   : > { %3838 = vmatmul.mubr.msk.bf16.vlgmr.msra.gmra.mrb[48].mxu0 %vm560_vm0, %v4419_v28  ;;  %3839 = vmatmul.mubr.msk.bf16.vlgmr.msra.gmra.mrb[48].mxu1 %vm560_vm0, %v4419_v28 }
 0x110   : > { %2673 = vmatpush1.bf16.msra.mxu0 %v3826_v52  ;;  %2714 = vmatpush1.bf16.msra.mxu1 %v3828_v53  ;;  %v3046_v52 = vld [vmem:[#allocation9 + $0x270] sm:$0xff]  ;;  %v3048_v53 = vrot.slane %v4416_v20, 2  ;;  %v438_v20 = vlaneseq }
 0x111   : > { %2674 = vmatprep.subr.bf16.mxu0 %v3835_v54  ;;  %2715 = vmatprep.subr.bf16.mxu1 %v3837_v55  ;;  %v3043_v54 = vld [vmem:[#allocation9 + $0x258] sm:$0xff]  ;;  %v3875_v57 = vcombine.high %v3042_v51, %v3046_v52  ;;  %v3874_v59 = vcombine.low %v3042_v51, %v3046_v52 }
 0x112   : > { %2704 = vmatprep.mubr.bf16.mxu0 %v4162_v0  ;;  %2745 = vmatprep.mubr.bf16.mxu1 %v4162_v0  ;;  %v3047_v55 = vld [vmem:[#allocation9 + $0x278] sm:$0xff] }
 0x113   : > { %v3877_v58 = vcombine.high %v3043_v54, %v3047_v55 }
 0x114   : > { %2675 = vmatpush1.bf16.msra.mxu0 %v3834_v60  ;;  %2716 = vmatpush1.bf16.msra.mxu1 %v3836_v61  ;;  %v3876_v60 = vcombine.low %v3043_v54, %v3047_v55  ;;  %v439_v61 = vshrl.u32 %v438_v20, 7 }
 0x115   : > { %2859 = vmatprep.subr.bf16.mxu0 %v3843_v62  ;;  %2900 = vmatprep.subr.bf16.mxu1 %v3845_v63 }
 0x116   : > { %v4533_v62 = vsub.s32 1, %v439_v61  ;;  %v4535_v63 = vsub.s32 2, %v439_v61  ;;  %v4540_v2 = vsub.s32 3, %v439_v61  ;;  %v4544_v3 = vsub.s32 0, %v439_v61 }
 0x117   : > { %3840 = vmatmul.mubr.msk.bf16.vlgmr.msra.gmra.mrb[52].mxu0 %vm560_vm0, %v4419_v28  ;;  %3841 = vmatmul.mubr.msk.bf16.vlgmr.msra.gmra.mrb[52].mxu1 %vm560_vm0, %v4419_v28  ;;  %v3848_v28 = vcombine.low %v2766_v12, %v2770_v13  ;;  %v4546_v4 = vsub.s32 5, %v439_v61 }
 0x118   : > { %2860 = vmatpush1.bf16.msra.mxu0 %v3842_v5  ;;  %2901 = vmatpush1.bf16.msra.mxu1 %v3844_v6  ;;  %v4548_v5 = vsub.s32 6, %v439_v61  ;;  %v4550_v6 = vld [vmem:[#allocation4] sm:$0xff]  ;;  %v832_v10 = vrot.slane %v736_v1, %v4533_v62  ;;  %v747_v11 = vrot.slane %v736_v1, %v4535_v63  ;;  %v836_v12 = vrot.slane %v736_v1, %v4540_v2 }
 0x119   : > { %2861 = vmatprep.subr.bf16.mxu0 %v3851_v7  ;;  %2902 = vmatprep.subr.bf16.mxu1 %v3853_v9  ;;  %v4552_v7 = vsub.s32 7, %v439_v61  ;;  %v743_v9 = vrot.slane %v736_v1, %v4544_v3  ;;  %v445_v36 = vrot.slane %v4550_v6, %v4533_v62  ;;  %v449_v19 = vrot.slane %v4550_v6, %v4535_v63 }
 0x11a   : > { %2891 = vmatprep.mubr.bf16.mxu0 %v4162_v0  ;;  %2932 = vmatprep.mubr.bf16.mxu1 %v4162_v0  ;;  %v876_v26 = vrot.slane %v836_v12, %v4533_v62 }
 0x11b   : > { %v844_v21 = vrot.slane %v736_v1, %v4552_v7  ;;  %v783_v22 = vrot.slane %v743_v9, %v4544_v3 }
 0x11c   : > { %2862 = vmatpush1.bf16.msra.mxu0 %v3850_v15  ;;  %2903 = vmatpush1.bf16.msra.mxu1 %v3852_v16  ;;  %v441_v15 = vrot.slane %v4550_v6, %v4544_v3  ;;  %v840_v16 = vrot.slane %v736_v1, %v4546_v4 }
 0x11d   : > { %2941 = vmatprep.subr.bf16.mxu0 %v3847_v17  ;;  %2982 = vmatprep.subr.bf16.mxu1 %v3849_v18  ;;  %v755_v17 = vrot.slane %v736_v1, %v4548_v5  ;;  %v4566_v18 = vld [vmem:[%s4790_s7 + $0x8] sm:$0xff] }
 0x11e   : > { %v759_v27 = vrot.slane %v4566_v18, %v4544_v3  ;;  %v848_v29 = vrot.slane %v4566_v18, %v4533_v62  ;;  %v856_v9 = vrot.slane %v4566_v18, %v4546_v4 }
 0x11f   : > { %3858 = vmatmul.mubr.msk.bf16.vlgmr.msra.gmra.mrb[56].mxu0 %vm560_vm0, %v4465_v8  ;;  %3859 = vmatmul.mubr.msk.bf16.vlgmr.msra.gmra.mrb[56].mxu1 %vm560_vm0, %v4465_v8  ;;  %v795_v34 = vrot.slane %v755_v17, %v4544_v3 }
 0x120   : > { %2942 = vmatpush1.bf16.msra.mxu0 %v3846_v23  ;;  %2983 = vmatpush1.bf16.msra.mxu1 %v3848_v28  ;;  %v872_v23 = vrot.slane %v832_v10, %v4533_v62  ;;  %v787_v28 = vrot.slane %v747_v11, %v4544_v3  ;;  %v799_v52 = vrot.slane %v759_v27, %v4544_v3 }
 0x121   : > { %2943 = vmatprep.subr.bf16.mxu0 %v3855_v24  ;;  %2984 = vmatprep.subr.bf16.mxu1 %v3857_v25  ;;  %v453_v24 = vrot.slane %v4550_v6, %v4540_v2  ;;  %v469_v10 = vrot.slane %v4550_v6, %v4552_v7 }
 0x122   : > { %2973 = vmatprep.mubr.bf16.mxu0 %v4162_v0  ;;  %3014 = vmatprep.mubr.bf16.mxu1 %v4162_v0 }
 0x124   : > { %2944 = vmatpush1.bf16.msra.mxu0 %v3854_v30  ;;  %2985 = vmatpush1.bf16.msra.mxu1 %v3856_v31 }
 0x125   : > { %3132 = vmatprep.subr.bf16.mxu0 %v3863_v32  ;;  %3173 = vmatprep.subr.bf16.mxu1 %v3865_v33  ;;  %v880_v33 = vrot.slane %v840_v16, %v4533_v62 }
 0x127   : > { %3860 = vmatmul.mubr.msk.bf16.vlgmr.msra.gmra.mrb[60].mxu0 %vm560_vm0, %v4465_v8  ;;  %3861 = vmatmul.mubr.msk.bf16.vlgmr.msra.gmra.mrb[60].mxu1 %vm560_vm0, %v4465_v8  ;;  %v3866_v8 = vcombine.low %v3034_v43, %v3038_v44 }
 0x128   : > { %3133 = vmatpush1.bf16.msra.mxu0 %v3862_v39  ;;  %3174 = vmatpush1.bf16.msra.mxu1 %v3864_v40 }
 0x129   : > { %3134 = vmatprep.subr.bf16.mxu0 %v3871_v41  ;;  %3175 = vmatprep.subr.bf16.mxu1 %v3873_v42  ;;  %v884_v41 = vrot.slane %v844_v21, %v4533_v62  ;;  %v461_v42 = vrot.slane %v4550_v6, %v4546_v4 }
 0x12a   : > { %3164 = vmatprep.mubr.bf16.mxu0 %v4162_v0  ;;  %3205 = vmatprep.mubr.bf16.mxu1 %v4162_v0 }
 0x12c   : > { %3135 = vmatpush1.bf16.msra.mxu0 %v3870_v47  ;;  %3176 = vmatpush1.bf16.msra.mxu1 %v3872_v48  ;;  %v763_v47 = vrot.slane %v4566_v18, %v4535_v63  ;;  %v852_v48 = vrot.slane %v4566_v18, %v4540_v2 }
 0x12d   : > { %3214 = vmatprep.subr.bf16.mxu0 %v3867_v49  ;;  %3255 = vmatprep.subr.bf16.mxu1 %v3869_v50 }
 0x12f   : > { %3878 = vmatmul.mubr.msk.bf16.vlgmr.msra.gmra.mrb[64].mxu0 %vm560_vm0, %v3048_v53  ;;  %3879 = vmatmul.mubr.msk.bf16.vlgmr.msra.gmra.mrb[64].mxu1 %vm560_vm0, %v3048_v53 }
 0x130   : > { %3215 = vmatpush1.bf16.msra.mxu0 %v3866_v8  ;;  %3256 = vmatpush1.bf16.msra.mxu1 %v3868_v56  ;;  %v465_v56 = vrot.slane %v4550_v6, %v4548_v5 }
 0x131   : > { %3216 = vmatprep.subr.bf16.mxu0 %v3875_v57  ;;  %3257 = vmatprep.subr.bf16.mxu1 %v3877_v58 }
 0x132   : > { %3246 = vmatprep.mubr.bf16.mxu0 %v4162_v0  ;;  %3287 = vmatprep.mubr.bf16.mxu1 %v4162_v0  ;;  %v4542_v0 = vsub.s32 4, %v439_v61  ;;  %v803_v61 = vrot.slane %v763_v47, %v4544_v3 }
 0x134   : > { %3217 = vmatpush1.bf16.msra.mxu0 %v3874_v59  ;;  %3258 = vmatpush1.bf16.msra.mxu1 %v3876_v60  ;;  %v751_v13 = vrot.slane %v736_v1, %v4542_v0  ;;  %v457_v35 = vrot.slane %v4550_v6, %v4542_v0  ;;  %v767_v1 = vrot.slane %v4566_v18, %v4542_v0 }
 0x136   : > { %v791_v14 = vrot.slane %v751_v13, %v4544_v3 }
 0x137   : > { %3880 = vmatmul.mubr.msk.bf16.vlgmr.msra.gmra.mrb[68].mxu0 %vm560_vm0, %v3048_v53  ;;  %3881 = vmatmul.mubr.msk.bf16.vlgmr.msra.gmra.mrb[68].mxu1 %vm560_vm0, %v3048_v53  ;;  %v888_v53 = vrot.slane %v848_v29, %v4533_v62  ;;  %v807_v29 = vrot.slane %v767_v1, %v4544_v3 }
 0x182   : > { %v598_v25 = vpop.f32.mrb[0].mxu0  ;;  %v639_v32 = vpop.f32.mrb[0].mxu1 }
 0x183   : > { %v599_v30 = vadd.f32 %v598_v25, %v441_v15  ;;  %v600_v31 = vpop.f32.mrb[1].mxu0  ;;  %v640_v39 = vadd.f32 %v639_v32, %v449_v19  ;;  %v641_v40 = vpop.f32.mrb[1].mxu1  ;;  %v892_v19 = vrot.slane %v852_v48, %v4533_v62 }
 0x184   : > { %v601_v37 = vadd.f32 %v600_v31, %v445_v36  ;;  %v602_v38 = vpop.f32.mrb[2].mxu0  ;;  %v642_v45 = vadd.f32 %v641_v40, %v453_v24  ;;  %v643_v46 = vpop.f32.mrb[2].mxu1 }
 0x185   : > { %v728_v43 = vmax.f32 %v599_v30, 0.0  ;;  %v603_v44 = vpop.f32.mrb[3].mxu0  ;;  %v730_v50 = vmax.f32 %v640_v39, 0.0  ;;  %v644_v51 = vpop.f32.mrb[3].mxu1  ;;  %v896_v30 = vrot.slane %v856_v9, %v4533_v62 }
 0x186   : > { %v729_v49 = vmax.f32 %v601_v37, 0.0  ;;  %v731_v8 = vmax.f32 %v642_v45, 0.0 }
 0x187   : > { %v812_v54 = vmul.f32 %v783_v22, %v728_v43  ;;  %v901_v55 = vmul.f32 %v872_v23, %v728_v43  ;;  %v814_v59 = vmul.f32 %v791_v14, %v730_v50  ;;  %v903_v60 = vmul.f32 %v880_v33, %v730_v50 }
 0x188   : > { %v813_v57 = vmul.f32 %v787_v28, %v729_v49  ;;  %v902_v58 = vmul.f32 %v876_v26, %v729_v49  ;;  %v815_v13 = vmul.f32 %v795_v34, %v731_v8  ;;  %v904_v15 = vmul.f32 %v884_v41, %v731_v8 }
 0x189   : > { %v860_v22 = vrot.slane %v4566_v18, %v4552_v7  ;;  %v771_v23 = vrot.slane %v4566_v18, %v4548_v5 }
 0x18a   : > { %v820_v11 = vadd.f32 %v813_v57, %v812_v54  ;;  %v909_v12 = vadd.f32 %v902_v58, %v901_v55  ;;  %v680_v16 = vpop.f32.mrb[4].mxu0  ;;  %v721_v21 = vpop.f32.mrb[4].mxu1 }
 0x18b   : > { %v681_v17 = vadd.f32 %v680_v16, %v457_v35  ;;  %v682_v36 = vpop.f32.mrb[5].mxu0  ;;  %v722_v26 = vadd.f32 %v721_v21, %v465_v56  ;;  %v723_v14 = vpop.f32.mrb[5].mxu1  ;;  %v900_v41 = vrot.slane %v860_v22, %v4533_v62  ;;  %v811_v45 = vrot.slane %v771_v23, %v4544_v3 }
 0x18c   : > { %v821_v28 = vadd.f32 %v820_v11, %v814_v59  ;;  %v910_v24 = vadd.f32 %v909_v12, %v903_v60  ;;  %v683_v25 = vadd.f32 %v682_v36, %v461_v42  ;;  %v684_v6 = vpop.f32.mrb[6].mxu0  ;;  %v724_v32 = vadd.f32 %v723_v14, %v469_v10  ;;  %v725_v33 = vpop.f32.mrb[6].mxu1 }
 0x18d   : > { %v732_v27 = vmax.f32 %v681_v17, 0.0  ;;  %v685_v31 = vpop.f32.mrb[7].mxu0  ;;  %v734_v38 = vmax.f32 %v722_v26, 0.0  ;;  %v726_v39 = vpop.f32.mrb[7].mxu1 }
 0x18e   : > { %v822_v34 = vadd.f32 %v821_v28, %v815_v13  ;;  %v911_v35 = vadd.f32 %v910_v24, %v904_v15  ;;  %v733_v37 = vmax.f32 %v683_v25, 0.0  ;;  %v735_v44 = vmax.f32 %v724_v32, 0.0  ;;  %v3780_v32 = vld [vmem:[%s4790_s7 + $0x10] sm:$0xff] }
 0x18f   : > { %v816_v18 = vmul.f32 %v799_v52, %v732_v27  ;;  %v905_v40 = vmul.f32 %v888_v53, %v732_v27  ;;  %v818_v48 = vmul.f32 %v807_v29, %v734_v38  ;;  %v907_v49 = vmul.f32 %v896_v30, %v734_v38 }
 0x190   : > { %v817_v42 = vmul.f32 %v803_v61, %v733_v37  ;;  %v906_v43 = vmul.f32 %v892_v19, %v733_v37  ;;  %v908_v52 = vmul.f32 %v900_v41, %v735_v44  ;;  %v819_v59 = vmul.f32 %v811_v45, %v735_v44 }
 0x191   : > { %v823_v46 = vadd.f32 %v822_v34, %v816_v18  ;;  %v912_v47 = vadd.f32 %v911_v35, %v905_v40  ;;  %v1792_v44 = vrot.slane %v3780_v32, %v4544_v3  ;;  %v1881_v45 = vrot.slane %v3780_v32, %v4533_v62 }
 0x192   : > { %v1067_v50 = vpop.f32.mrb[8].mxu0  ;;  %v1108_v55 = vpop.f32.mrb[8].mxu1 }
 0x193   : > { %v913_v51 = vadd.f32 %v912_v47, %v906_v43  ;;  %v1069_v54 = vpop.f32.mrb[9].mxu0  ;;  %v824_v8 = vadd.f32 %v823_v46, %v817_v42  ;;  %v1110_v57 = vpop.f32.mrb[9].mxu1  ;;  %v4626_v43 = vld [vmem:[#allocation7] sm:$0xff]  ;;  %v1800_v47 = vrot.slane %v3780_v32, %v4542_v0 }
 0x194   : > { %v1071_v56 = vpop.f32.mrb[10].mxu0  ;;  %v1112_v58 = vpop.f32.mrb[10].mxu1 }
 0x195   : > { %v1072_v53 = vpop.f32.mrb[11].mxu0  ;;  %v825_v60 = vadd.f32 %v824_v8, %v818_v48  ;;  %v914_v61 = vadd.f32 %v913_v51, %v907_v49  ;;  %v1113_v1 = vpop.f32.mrb[11].mxu1  ;;  %v1889_v48 = vrot.slane %v3780_v32, %v4546_v4  ;;  %v1796_v49 = vrot.slane %v3780_v32, %v4535_v63 }
 0x196   : > { %v1804_v51 = vrot.slane %v3780_v32, %v4548_v5  ;;  %v1739_v8 = vrot.slane %v4626_v43, %v4535_v63  ;;  %v1832_v56 = vrot.slane %v1792_v44, %v4544_v3  ;;  %v1743_v53 = vrot.slane %v4626_v43, %v4540_v2 }
 0x197   : > { %v826_v9 = vadd.f32 %v825_v60, %v819_v59  ;;  %v915_v10 = vadd.f32 %v914_v61, %v908_v52  ;;  %v1735_v52 = vrot.slane %v4626_v43, %v4533_v62  ;;  %v1840_v59 = vrot.slane %v1800_v47, %v4544_v3 }
 0x198   : > { %v1929_v60 = vrot.slane %v1889_v48, %v4533_v62  ;;  %v1836_v61 = vrot.slane %v1796_v49, %v4544_v3 }
 0x199   : > { %827 = vadd.xlane.f32.xlu0 %v826_v9  ;;  %v4653_v9 = vld [vmem:[%s4790_s7 + $0x18] sm:$0xff] }
 0x19a   : > { %v1149_v11 = vpop.f32.mrb[12].mxu0  ;;  %v1190_v13 = vpop.f32.mrb[12].mxu1  ;;  %v1820_v44 = vrot.slane %v4653_v9, %v4548_v5 }
 0x19b   : > { %v1151_v12 = vpop.f32.mrb[13].mxu0  ;;  %v1192_v16 = vpop.f32.mrb[13].mxu1 }
 0x19c   : > { %v1153_v15 = vpop.f32.mrb[14].mxu0  ;;  %v1194_v36 = vpop.f32.mrb[14].mxu1 }
 0x19d   : > { %v1154_v17 = vpop.f32.mrb[15].mxu0  ;;  %916 = vadd.xlane.f32.xlu0 %v915_v10  ;;  %v1195_v19 = vpop.f32.mrb[15].mxu1 }
 0x1a2   : > { %v1321_v21 = vpop.f32.mrb[16].mxu0  ;;  %v1362_v23 = vpop.f32.mrb[16].mxu1 }
 0x1a3   : > { %v1322_v22 = vadd.f32 %v1321_v21, %v1067_v50  ;;  %v1323_v28 = vpop.f32.mrb[17].mxu0  ;;  %v1363_v24 = vadd.f32 %v1362_v23, %v1108_v55  ;;  %v1364_v6 = vpop.f32.mrb[17].mxu1  ;;  %v1885_v50 = vrot.slane %v3780_v32, %v4540_v2  ;;  %v1731_v55 = vrot.slane %v4626_v43, %v4544_v3 }
 0x1a4   : > { %v1324_v25 = vadd.f32 %v1323_v28, %v1069_v54  ;;  %v1325_v26 = vpop.f32.mrb[18].mxu0  ;;  %v1365_v14 = vadd.f32 %v1364_v6, %v1110_v57  ;;  %v1366_v29 = vpop.f32.mrb[18].mxu1  ;;  %v1893_v54 = vrot.slane %v3780_v32, %v4552_v7  ;;  %v1921_v57 = vrot.slane %v1881_v45, %v4533_v62 }
 0x1a5   : > { %v1326_v27 = vpop.f32.mrb[19].mxu0  ;;  %v1367_v30 = vpop.f32.mrb[19].mxu1  ;;  %v1925_v1 = vrot.slane %v1885_v50, %v4533_v62  ;;  %v1755_v23 = vrot.slane %v4626_v43, %v4548_v5  ;;  %v1751_v28 = vrot.slane %v4626_v43, %v4546_v4  ;;  %v1808_v29 = vrot.slane %v4653_v9, %v4544_v3 }
 0x1a6   : > { %v1933_v15 = vrot.slane %v1893_v54, %v4533_v62  ;;  %v1759_v30 = vrot.slane %v4626_v43, %v4552_v7  ;;  %v1897_v32 = vrot.slane %v4653_v9, %v4533_v62 }
 0x1a7   : > { %v1848_v48 = vrot.slane %v1808_v29, %v4544_v3 }
 0x1a8   : > { %v1937_v54 = vrot.slane %v1897_v32, %v4533_v62 }
 0x1aa   : > { %v1403_v31 = vpop.f32.mrb[20].mxu0  ;;  %v1444_v34 = vpop.f32.mrb[20].mxu1 }
 0x1ab   : > { %v4618_v33 = vadd.f32 %v1403_v31, %v1149_v11  ;;  %v1405_v35 = vpop.f32.mrb[21].mxu0  ;;  %v4620_v37 = vadd.f32 %v1444_v34, %v1190_v13  ;;  %v1446_v39 = vpop.f32.mrb[21].mxu1  ;;  %v1844_v13 = vrot.slane %v1804_v51, %v4544_v3  ;;  %v1812_v34 = vrot.slane %v4653_v9, %v4535_v63 }
 0x1ac   : > { %v4622_v38 = vadd.f32 %v1405_v35, %v1151_v12  ;;  %v1407_v18 = vpop.f32.mrb[22].mxu0  ;;  %v4624_v40 = vadd.f32 %v1446_v39, %v1192_v16  ;;  %v1448_v42 = vpop.f32.mrb[22].mxu1  ;;  %v1747_v16 = vrot.slane %v4626_v43, %v4542_v0  ;;  %v1816_v43 = vrot.slane %v4653_v9, %v4542_v0 }
 0x1ad   : > { %v1408_v41 = vpop.f32.mrb[23].mxu0  ;;  %v1449_v46 = vpop.f32.mrb[23].mxu1  ;;  %v1901_v18 = vrot.slane %v4653_v9, %v4540_v2 }
 0x1b2   : > { %v1588_v58 = vpop.f32.mrb[24].mxu0  ;;  %v1629_v11 = vpop.f32.mrb[24].mxu1 }
 0x1b3   : > { %v1718_v10 = vadd.f32 %v1588_v58, %v1322_v22  ;;  %v1590_v12 = vpop.f32.mrb[25].mxu0  ;;  %v1720_v17 = vadd.f32 %v1629_v11, %v1363_v24  ;;  %v1631_v19 = vpop.f32.mrb[25].mxu1  ;;  %v1941_v11 = vrot.slane %v1901_v18, %v4533_v62 }
 0x1b4   : > { %v1719_v36 = vadd.f32 %v1590_v12, %v1324_v25  ;;  %v1592_v21 = vpop.f32.mrb[26].mxu0  ;;  %v1721_v6 = vadd.f32 %v1631_v19, %v1365_v14  ;;  %v1633_v27 = vpop.f32.mrb[26].mxu1  ;;  %v1905_v14 = vrot.slane %v4653_v9, %v4546_v4 }
 0x1b5   : > { %v1768_v22 = vadd.f32 %v1731_v55, %v1718_v10  ;;  %v1593_v26 = vpop.f32.mrb[27].mxu0  ;;  %v1770_v24 = vadd.f32 %v1739_v8, %v1720_v17  ;;  %v1634_v31 = vpop.f32.mrb[27].mxu1  ;;  %v1852_v55 = vrot.slane %v1812_v34, %v4544_v3  ;;  %v1856_v34 = vrot.slane %v1816_v43, %v4544_v3 }
 0x1b6   : > { %v1769_v25 = vadd.f32 %v1735_v52, %v1719_v36  ;;  %v1771_v39 = vadd.f32 %v1743_v53, %v1721_v6 }
 0x1b7   : > { %v1776_v35 = vmax.f32 %v1768_v22, 0.0  ;;  %v1778_v41 = vmax.f32 %v1770_v24, 0.0 }
 0x1b8   : > { %v1777_v42 = vmax.f32 %v1769_v25, 0.0  ;;  %v1779_v47 = vmax.f32 %v1771_v39, 0.0 }
 0x1b9   : > { %v1861_v45 = vmul.f32 %v1832_v56, %v1776_v35  ;;  %v1950_v46 = vmul.f32 %v1921_v57, %v1776_v35  ;;  %v1863_v8 = vmul.f32 %v1840_v59, %v1778_v41  ;;  %v1952_v52 = vmul.f32 %v1929_v60, %v1778_v41 }
 0x1ba   : > { %v1862_v49 = vmul.f32 %v1836_v61, %v1777_v42  ;;  %v1951_v50 = vmul.f32 %v1925_v1, %v1777_v42  ;;  %v1670_v51 = vpop.f32.mrb[28].mxu0  ;;  %v1711_v58 = vpop.f32.mrb[28].mxu1  ;;  %v1864_v36 = vmul.f32 %v1844_v13, %v1779_v47  ;;  %v1953_v19 = vmul.f32 %v1933_v15, %v1779_v47 }
 0x1bb   : > { %v1722_v53 = vadd.f32 %v1670_v51, %v4618_v33  ;;  %v1672_v10 = vpop.f32.mrb[29].mxu0  ;;  %v1724_v12 = vadd.f32 %v1711_v58, %v4620_v37  ;;  %v1713_v1 = vpop.f32.mrb[29].mxu1  ;;  %v1909_v37 = vrot.slane %v4653_v9, %v4552_v7  ;;  %v1945_v13 = vrot.slane %v1905_v14, %v4533_v62 }
 0x1bc   : > { %v1869_v56 = vadd.f32 %v1862_v49, %v1861_v45  ;;  %v1958_v57 = vadd.f32 %v1951_v50, %v1950_v46  ;;  %v1723_v61 = vadd.f32 %v1672_v10, %v4622_v38  ;;  %v1674_v17 = vpop.f32.mrb[30].mxu0  ;;  %v1725_v59 = vadd.f32 %v1713_v1, %v4624_v40  ;;  %v1715_v22 = vpop.f32.mrb[30].mxu1 }
 0x1bd   : > { %v1772_v21 = vadd.f32 %v1747_v16, %v1722_v53  ;;  %v1675_v60 = vpop.f32.mrb[31].mxu0  ;;  %v1774_v26 = vadd.f32 %v1755_v23, %v1724_v12  ;;  %v1716_v29 = vpop.f32.mrb[31].mxu1  ;;  %v1949_v45 = vrot.slane %v1909_v37, %v4533_v62 }
 0x1be   : > { %v1870_v33 = vadd.f32 %v1869_v56, %v1863_v8  ;;  %v1959_v6 = vadd.f32 %v1958_v57, %v1952_v52  ;;  %v1773_v27 = vadd.f32 %v1751_v28, %v1723_v61  ;;  %v1775_v25 = vadd.f32 %v1759_v30, %v1725_v59 }
 0x1bf   : > { %v1780_v24 = vmax.f32 %v1772_v21, 0.0  ;;  %v1782_v40 = vmax.f32 %v1774_v26, 0.0  ;;  %v1860_v28 = vrot.slane %v1820_v44, %v4544_v3 }
 0x1c0   : > { %v1871_v38 = vadd.f32 %v1870_v33, %v1864_v36  ;;  %v1960_v31 = vadd.f32 %v1959_v6, %v1953_v19  ;;  %v1781_v15 = vmax.f32 %v1773_v27, 0.0  ;;  %v1783_v30 = vmax.f32 %v1775_v25, 0.0 }
 0x1c1   : > { %v1865_v16 = vmul.f32 %v1848_v48, %v1780_v24  ;;  %v1954_v32 = vmul.f32 %v1937_v54, %v1780_v24  ;;  %v1956_v47 = vmul.f32 %v1945_v13, %v1782_v40  ;;  %v1867_v50 = vmul.f32 %v1856_v34, %v1782_v40 }
 0x1c2   : > { %v1866_v35 = vmul.f32 %v1852_v55, %v1781_v15  ;;  %v1955_v39 = vmul.f32 %v1941_v11, %v1781_v15  ;;  %v2116_v23 = vpop.f32.mrb[32].mxu0  ;;  %v2157_v42 = vpop.f32.mrb[32].mxu1  ;;  %v1868_v55 = vmul.f32 %v1860_v28, %v1783_v30  ;;  %v1957_v52 = vmul.f32 %v1949_v45, %v1783_v30 }
 0x1c3   : > { %v1961_v18 = vadd.f32 %v1960_v31, %v1954_v32  ;;  %v2118_v41 = vpop.f32.mrb[33].mxu0  ;;  %v1872_v9 = vadd.f32 %v1871_v38, %v1865_v16  ;;  %v2159_v14 = vpop.f32.mrb[33].mxu1 }
 0x1c4   : > { %v2120_v46 = vpop.f32.mrb[34].mxu0  ;;  %v2161_v49 = vpop.f32.mrb[34].mxu1 }
 0x1c5   : > { %v2121_v48 = vpop.f32.mrb[35].mxu0  ;;  %v1873_v51 = vadd.f32 %v1872_v9, %v1866_v35  ;;  %v1962_v43 = vadd.f32 %v1961_v18, %v1955_v39  ;;  %v2162_v54 = vpop.f32.mrb[35].mxu1 }
 0x1c7   : > { %v1874_v8 = vadd.f32 %v1873_v51, %v1867_v50  ;;  %v1963_v44 = vadd.f32 %v1962_v43, %v1956_v47 }
 0x1c9   : > { %v1875_v53 = vadd.f32 %v1874_v8, %v1868_v55  ;;  %v1964_v58 = vadd.f32 %v1963_v44, %v1957_v52 }
 0x1ca   : > { %v2198_v10 = vpop.f32.mrb[36].mxu0  ;;  %v2239_v56 = vpop.f32.mrb[36].mxu1 }
 0x1cb   : > { %v2200_v11 = vpop.f32.mrb[37].mxu0  ;;  %1876 = vadd.xlane.f32.xlu1 %v1875_v53  ;;  %v2241_v12 = vpop.f32.mrb[37].mxu1 }
 0x1cc   : > { %v2202_v57 = vpop.f32.mrb[38].mxu0  ;;  %v2243_v1 = vpop.f32.mrb[38].mxu1 }
 0x1cd   : > { %v2203_v61 = vpop.f32.mrb[39].mxu0  ;;  %v2244_v17 = vpop.f32.mrb[39].mxu1 }
 0x1cf   : > { %1965 = vadd.xlane.f32.xlu1 %v1964_v58 }
 0x1d2   : > { %v2363_v36 = vpop.f32.mrb[40].mxu0  ;;  %v2404_v21 = vpop.f32.mrb[40].mxu1 }
 0x1d3   : > { %v2364_v19 = vadd.f32 %v2363_v36, %v2116_v23  ;;  %v2365_v59 = vpop.f32.mrb[41].mxu0  ;;  %v2405_v60 = vadd.f32 %v2404_v21, %v2157_v42  ;;  %v2406_v33 = vpop.f32.mrb[41].mxu1 }
 0x1d4   : > { %v2366_v22 = vadd.f32 %v2365_v59, %v2118_v41  ;;  %v2367_v6 = vpop.f32.mrb[42].mxu0  ;;  %v2407_v26 = vadd.f32 %v2406_v33, %v2159_v14  ;;  %v2408_v29 = vpop.f32.mrb[42].mxu1  ;;  %v3882_v33 = vld [vmem:[%s4790_s7 + $0x20] sm:$0xff] }
 0x1d5   : > { %v2368_v27 = vpop.f32.mrb[43].mxu0  ;;  %v2409_v24 = vpop.f32.mrb[43].mxu1 }
 0x1da   : > { %v2445_v25 = vpop.f32.mrb[44].mxu0  ;;  %v2486_v38 = vpop.f32.mrb[44].mxu1 }
 0x1db   : > { %v2446_v37 = vadd.f32 %v2445_v25, %v2198_v10  ;;  %v2447_v31 = vpop.f32.mrb[45].mxu0  ;;  %v2487_v13 = vadd.f32 %v2486_v38, %v2239_v56  ;;  %v2488_v16 = vpop.f32.mrb[45].mxu1 }
 0x1dc   : > { %v2448_v15 = vadd.f32 %v2447_v31, %v2200_v11  ;;  %v2449_v32 = vpop.f32.mrb[46].mxu0  ;;  %v2489_v40 = vadd.f32 %v2488_v16, %v2241_v12  ;;  %v2490_v35 = vpop.f32.mrb[46].mxu1  ;;  %v3370_v16 = vrot.slane %v3882_v33, %v4544_v3 }
 0x1dd   : > { %v2450_v34 = vpop.f32.mrb[47].mxu0  ;;  %v2491_v39 = vpop.f32.mrb[47].mxu1  ;;  %v3467_v35 = vrot.slane %v3882_v33, %v4546_v4 }
 0x1de   : > { %v3378_v34 = vrot.slane %v3882_v33, %v4542_v0  ;;  %v3374_v39 = vrot.slane %v3882_v33, %v4535_v63 }
 0x1e2   : > { %v2624_v23 = vpop.f32.mrb[48].mxu0  ;;  %v2665_v18 = vpop.f32.mrb[48].mxu1 }
 0x1e3   : > { %v2754_v28 = vadd.f32 %v2624_v23, %v2364_v19  ;;  %v2626_v30 = vpop.f32.mrb[49].mxu0  ;;  %v2756_v41 = vadd.f32 %v2665_v18, %v2405_v60  ;;  %v2667_v9 = vpop.f32.mrb[49].mxu1  ;;  %v4714_v23 = vld [vmem:[%s4790_s7 + $0x28] sm:$0xff]  ;;  %v3382_v18 = vrot.slane %v3882_v33, %v4548_v5 }
 0x1e4   : > { %v2755_v42 = vadd.f32 %v2626_v30, %v2366_v22  ;;  %v2628_v45 = vpop.f32.mrb[50].mxu0  ;;  %v2757_v46 = vadd.f32 %v2667_v9, %v2407_v26  ;;  %v2669_v47 = vpop.f32.mrb[50].mxu1  ;;  %v3410_v9 = vrot.slane %v3370_v16, %v4544_v3 }
 0x1e5   : > { %v2629_v14 = vpop.f32.mrb[51].mxu0  ;;  %v2670_v48 = vpop.f32.mrb[51].mxu1 }
 0x1e6   : > { %v3386_v14 = vrot.slane %v4714_v23, %v4544_v3 }
 0x1ea   : > { %v2706_v49 = vpop.f32.mrb[52].mxu0  ;;  %v2747_v51 = vpop.f32.mrb[52].mxu1 }
 0x1eb   : > { %v2758_v50 = vadd.f32 %v2706_v49, %v2446_v37  ;;  %v2708_v43 = vpop.f32.mrb[53].mxu0  ;;  %v2760_v54 = vadd.f32 %v2747_v51, %v2487_v13  ;;  %v2749_v8 = vpop.f32.mrb[53].mxu1  ;;  %v3418_v49 = vrot.slane %v3378_v34, %v4544_v3  ;;  %v3414_v51 = vrot.slane %v3374_v39, %v4544_v3 }
 0x1ec   : > { %v2759_v55 = vadd.f32 %v2708_v43, %v2448_v15  ;;  %v2710_v52 = vpop.f32.mrb[54].mxu0  ;;  %v2761_v44 = vadd.f32 %v2749_v8, %v2489_v40  ;;  %v2751_v58 = vpop.f32.mrb[54].mxu1  ;;  %v4704_v15 = vld [vmem:[#allocation10] sm:$0xff]  ;;  %v3459_v40 = vrot.slane %v3882_v33, %v4533_v62 }
 0x1ed   : > { %v2711_v53 = vpop.f32.mrb[55].mxu0  ;;  %v2752_v10 = vpop.f32.mrb[55].mxu1  ;;  %v3309_v30 = vrot.slane %v4704_v15, %v4544_v3  ;;  %v3321_v45 = vrot.slane %v4704_v15, %v4540_v2  ;;  %v3422_v52 = vrot.slane %v3382_v18, %v4544_v3 }
 0x1ee   : > { %v3499_v48 = vrot.slane %v3459_v40, %v4533_v62 }
 0x1f2   : > { %v2893_v11 = vpop.f32.mrb[56].mxu0  ;;  %v2934_v57 = vpop.f32.mrb[56].mxu1 }
 0x1f3   : > { %v3023_v56 = vadd.f32 %v2893_v11, %v2754_v28  ;;  %v2895_v12 = vpop.f32.mrb[57].mxu0  ;;  %v3025_v61 = vadd.f32 %v2934_v57, %v2756_v41  ;;  %v2936_v17 = vpop.f32.mrb[57].mxu1  ;;  %v3463_v28 = vrot.slane %v3882_v33, %v4540_v2  ;;  %v3317_v41 = vrot.slane %v4704_v15, %v4535_v63 }
 0x1f4   : > { %v3024_v1 = vadd.f32 %v2895_v12, %v2755_v42  ;;  %v2897_v36 = vpop.f32.mrb[58].mxu0  ;;  %v3026_v19 = vadd.f32 %v2936_v17, %v2757_v46  ;;  %v2938_v59 = vpop.f32.mrb[58].mxu1  ;;  %v3313_v42 = vrot.slane %v4704_v15, %v4533_v62  ;;  %v3471_v46 = vrot.slane %v3882_v33, %v4552_v7 }
 0x1f5   : > { %v2898_v21 = vpop.f32.mrb[59].mxu0  ;;  %v2939_v60 = vpop.f32.mrb[59].mxu1  ;;  %v3503_v8 = vrot.slane %v3463_v28, %v4533_v62  ;;  %v3475_v57 = vrot.slane %v4714_v23, %v4533_v62  ;;  %v3333_v12 = vrot.slane %v4704_v15, %v4548_v5 }
 0x1f6   : > { %v3511_v36 = vrot.slane %v3471_v46, %v4533_v62  ;;  %v3426_v60 = vrot.slane %v3386_v14, %v4544_v3 }
 0x1f7   : > { %v3515_v16 = vrot.slane %v3475_v57, %v4533_v62 }
 0x1fa   : > { %v2975_v22 = vpop.f32.mrb[60].mxu0  ;;  %v3016_v26 = vpop.f32.mrb[60].mxu1 }
 0x1fb   : > { %v4696_v6 = vadd.f32 %v2975_v22, %v2758_v50  ;;  %v2977_v27 = vpop.f32.mrb[61].mxu0  ;;  %v4698_v29 = vadd.f32 %v3016_v26, %v2760_v54  ;;  %v3018_v25 = vpop.f32.mrb[61].mxu1  ;;  %v3507_v50 = vrot.slane %v3467_v35, %v4533_v62  ;;  %v3390_v26 = vrot.slane %v4714_v23, %v4535_v63 }
 0x1fc   : > { %v4700_v24 = vadd.f32 %v2977_v27, %v2759_v55  ;;  %v2979_v37 = vpop.f32.mrb[62].mxu0  ;;  %v4702_v38 = vadd.f32 %v3018_v25, %v2761_v44  ;;  %v3020_v13 = vpop.f32.mrb[62].mxu1  ;;  %v3325_v44 = vrot.slane %v4704_v15, %v4542_v0  ;;  %v3337_v63 = vrot.slane %v4704_v15, %v4552_v7 }
 0x1fd   : > { %v2980_v31 = vpop.f32.mrb[63].mxu0  ;;  %v3021_v32 = vpop.f32.mrb[63].mxu1  ;;  %v3479_v37 = vrot.slane %v4714_v23, %v4540_v2  ;;  %v3430_v18 = vrot.slane %v3390_v26, %v4544_v3  ;;  %v3487_v2 = vrot.slane %v4714_v23, %v4552_v7 }
 0x1fe   : > { %v3329_v32 = vrot.slane %v4704_v15, %v4546_v4 }
 0x202   : > { %v3166_v47 = vpop.f32.mrb[64].mxu0  ;;  %v3207_v54 = vpop.f32.mrb[64].mxu1 }
 0x203   : > { %v3296_v43 = vadd.f32 %v3166_v47, %v3023_v56  ;;  %v3168_v55 = vpop.f32.mrb[65].mxu0  ;;  %v3298_v53 = vadd.f32 %v3207_v54, %v3025_v61  ;;  %v3209_v10 = vpop.f32.mrb[65].mxu1 }
 0x204   : > { %v3297_v58 = vadd.f32 %v3168_v55, %v3024_v1  ;;  %v3170_v11 = vpop.f32.mrb[66].mxu0  ;;  %v3299_v17 = vadd.f32 %v3209_v10, %v3026_v19  ;;  %v3211_v59 = vpop.f32.mrb[66].mxu1  ;;  %v3394_v1 = vrot.slane %v4714_v23, %v4542_v0  ;;  %v3483_v19 = vrot.slane %v4714_v23, %v4546_v4 }
 0x205   : > { %v3346_v56 = vadd.f32 %v3309_v30, %v3296_v43  ;;  %v3171_v21 = vpop.f32.mrb[67].mxu0  ;;  %v3348_v22 = vadd.f32 %v3317_v41, %v3298_v53  ;;  %v3212_v61 = vpop.f32.mrb[67].mxu1 }
 0x206   : > { %v3347_v33 = vadd.f32 %v3313_v42, %v3297_v58  ;;  %v3349_v25 = vadd.f32 %v3321_v45, %v3299_v17  ;;  %v3523_v21 = vrot.slane %v3483_v19, %v4533_v62 }
 0x207   : > { %v3354_v27 = vmax.f32 %v3346_v56, 0.0  ;;  %v3356_v31 = vmax.f32 %v3348_v22, 0.0 }
 0x208   : > { %v3355_v13 = vmax.f32 %v3347_v33, 0.0  ;;  %v3357_v34 = vmax.f32 %v3349_v25, 0.0 }
 0x209   : > { %v3439_v40 = vmul.f32 %v3410_v9, %v3354_v27  ;;  %v3528_v0 = vmul.f32 %v3499_v48, %v3354_v27  ;;  %v3441_v30 = vmul.f32 %v3418_v49, %v3356_v31  ;;  %v3530_v41 = vmul.f32 %v3507_v50, %v3356_v31 }
 0x20a   : > { %v3440_v35 = vmul.f32 %v3414_v51, %v3355_v13  ;;  %v3529_v39 = vmul.f32 %v3503_v8, %v3355_v13  ;;  %v3248_v28 = vpop.f32.mrb[68].mxu0  ;;  %v3289_v45 = vpop.f32.mrb[68].mxu1  ;;  %v3519_v9 = vrot.slane %v3479_v37, %v4533_v62  ;;  %v3442_v43 = vmul.f32 %v3422_v52, %v3357_v34 }
 0x20b   : > { %v3300_v42 = vadd.f32 %v3248_v28, %v4696_v6  ;;  %v3250_v4 = vpop.f32.mrb[69].mxu0  ;;  %v3302_v15 = vadd.f32 %v3289_v45, %v4698_v29  ;;  %v3291_v48 = vpop.f32.mrb[69].mxu1  ;;  %v3531_v54 = vmul.f32 %v3511_v36, %v3357_v34  ;;  %v3398_v29 = vrot.slane %v4714_v23, %v4548_v5 }
 0x20c   : > { %v3447_v46 = vadd.f32 %v3440_v35, %v3439_v40  ;;  %v3536_v14 = vadd.f32 %v3529_v39, %v3528_v0  ;;  %v3301_v47 = vadd.f32 %v3250_v4, %v4700_v24  ;;  %v3252_v51 = vpop.f32.mrb[70].mxu0  ;;  %v3303_v7 = vadd.f32 %v3291_v48, %v4702_v38  ;;  %v3293_v50 = vpop.f32.mrb[70].mxu1 }
 0x20d   : > { %v3350_v55 = vadd.f32 %v3325_v44, %v3300_v42  ;;  %v3253_v49 = vpop.f32.mrb[71].mxu0  ;;  %v3352_v53 = vadd.f32 %v3333_v12, %v3302_v15  ;;  %v3294_v10 = vpop.f32.mrb[71].mxu1  ;;  %v3434_v52 = vrot.slane %v3394_v1, %v4544_v3  ;;  %v3527_v12 = vrot.slane %v3487_v2, %v4533_v62 }
 0x20e   : > { %v3448_v6 = vadd.f32 %v3447_v46, %v3441_v30  ;;  %v3537_v8 = vadd.f32 %v3536_v14, %v3530_v41  ;;  %v3351_v58 = vadd.f32 %v3329_v32, %v3301_v47  ;;  %v3353_v57 = vadd.f32 %v3337_v63, %v3303_v7  ;;  %v3884_v30 = vld [vmem:[%s4791_s8] ss:$0 sm:$0xff] }
 0x20f   : > { %v3358_v11 = vmax.f32 %v3350_v55, 0.0  ;;  %v3360_v38 = vmax.f32 %v3352_v53, 0.0  ;;  %v3438_v27 = vrot.slane %v3398_v29, %v4544_v3  ;;  %v3548_v34 = vand.u32 127, %v438_v20 }
 0x210   : > { %v3449_v24 = vadd.f32 %v3448_v6, %v3442_v43  ;;  %v3538_v56 = vadd.f32 %v3537_v8, %v3531_v54  ;;  %v3359_v17 = vmax.f32 %v3351_v58, 0.0  ;;  %v3361_v26 = vmax.f32 %v3353_v57, 0.0 }
 0x211   : > { %v3443_v44 = vmul.f32 %v3426_v60, %v3358_v11  ;;  %v3532_v36 = vmul.f32 %v3515_v16, %v3358_v11  ;;  %v3445_v5 = vmul.f32 %v3434_v52, %v3360_v38  ;;  %v3534_v23 = vmul.f32 %v3523_v21, %v3360_v38 }
 0x212   : > { %v3444_v59 = vmul.f32 %v3430_v18, %v3359_v17  ;;  %v3533_v22 = vmul.f32 %v3519_v9, %v3359_v17  ;;  %v3535_v1 = vmul.f32 %v3527_v12, %v3361_v26  ;;  %v3446_v60 = vmul.f32 %v3438_v27, %v3361_v26 }
 0x213   : > { %v3450_v33 = vadd.f32 %v3449_v24, %v3443_v44  ;;  %v3539_v61 = vadd.f32 %v3538_v56, %v3532_v36  ;;  %vm3552_vm1 = vcmp.eq.s32.totalorder %v3548_v34, 1  ;;  %vm3549_vm2 = vcmp.eq.s32.totalorder %v3548_v34, 0 }
 0x215   : > { %v3540_v25 = vadd.f32 %v3539_v61, %v3533_v22  ;;  %v3451_v37 = vadd.f32 %v3450_v33, %v3444_v59 }
 0x217   : > { %v3541_v31 = vadd.f32 %v3540_v25, %v3534_v23  ;;  %v3452_v13 = vadd.f32 %v3451_v37, %v3445_v5 }
 0x219   : > { %v3542_v16 = vadd.f32 %v3541_v31, %v3535_v1  ;;  %v3453_v32 = vadd.f32 %v3452_v13, %v3446_v60 }
 0x21b   : > { %3543 = vadd.xlane.f32.xlu1 %v3542_v16  ;;  %3454 = vadd.xlane.f32.xlu0 %v3453_v32 }
 0x226   : > { %v828_v19 = vpop.xlane.xlu0 %827 }
 0x22a   : > { %v917_v62 = vpop.xlane.xlu0 %916 }
 0x258   : > { %v1877_v40 = vpop.xlane.xlu1 %1876 }
 0x259   : > { %v1967_v3 = vadd.f32 %v1877_v40, %v828_v19 }
 0x25c   : > { %v1966_v0 = vpop.xlane.xlu1 %1965 }
 0x25d   : > { %v1968_v63 = vadd.f32 %v1966_v0, %v917_v62 }
 0x2a8   : > { %v3544_v35 = vpop.xlane.xlu1 %3543  ;;  %v3455_v39 = vpop.xlane.xlu0 %3454 }
 0x2a9   : > { %v3546_v28 = vadd.f32 %v3544_v35, %v1968_v63  ;;  %v3545_v18 = vadd.f32 %v3455_v39, %v1967_v3 }
 0x2ab   : > { %v3553_v2 = vsel %vm3552_vm1, %v3546_v28, 0.0  ;;  %v3550_v41 = vsel %vm3549_vm2, %v3545_v18, 0.0 }
 0x2ac   : > { %v3554_v42 = vadd.f32 %v3553_v2, %v3550_v41 }
 0x2ae   : > { %v3562_v20 = vadd.f32 %v3884_v30, %v3554_v42 }
 0x2b0   : > { %3564 = vst.msk [vmem:[%s412_s26] sm:$0xff] %vm3563_vm3, %v3562_v20 }
 0x2b1 PF: > { %s23_s30 = sadd.s32 1, %s4152_s30  }
 0x2b2   : > { %p20_p9 = scmp.ge.s32.totalorder %s23_s30, 4  }
 0x2b4   :  { %22 = sbr.rel (!%p20_p9) target bundleno = 4 (0x4), region = 119 }
 0x2bb   :  { %3584 = vsyncpa [#allocation3], 1 }
 0x2bc   :  { %3586 = vsyncpa [#allocation3 + $0x1], 1 }
 0x2bd   :  { %3587 = vsyncpa [#allocation5], 1 }
 0x2be   :  { %3588 = vsyncpa [#allocation8], 1 }
 0x2bf   :  { %3589 = vsyncpa [#allocation11], 1 }

</bundles_post_ra>
